<compile_context>
chip_gen: v7x
topology: tpu7x:2x2x1
jax: 0.10.0
libtpu: 0.0.40
codegen_flags: <defaults>
</compile_context>

<pallas_src>
import jax
import jax.numpy as jnp
from jax.experimental import pallas as pl
from jax.experimental.pallas import tpu as pltpu

# ---- problem sizes (small, consistent with the module defaults) ----
N, Cin, H, W = 2, 16, 16, 16
Cout = 64
BOTTLENECK = 2
CARDINALITY = 32
Cmid = Cout // BOTTLENECK          # 32 -> channels-per-group = 1 (depthwise)
HW = H * W
NHW = N * HW
EPS = 1e-5

assert H >= 2 and W >= 2, "reflect padding of 1 requires H, W >= 2"
# TODO(synk): general grouped conv (channels-per-group > 1) is not implemented;
# the default config (cardinality == Cmid) is the depthwise special case.
assert Cmid % CARDINALITY == 0 and Cmid // CARDINALITY == 1


def resnext_block_kernel(x_ref, w1_ref, wp_ref, w3_ref, pm_ref, po_ref, o_ref):
    """One grid step processes the whole batch (channels on sublanes, pixels on lanes).

    x_ref : (Cin+1, N*HW)  activations + trailing ones row (bias folding)
    w1_ref: (Cmid, Cin+1)  conv1 1x1, BN1 scale folded, bias col = BN1 shift
    wp_ref: (Cout, Cin+1)  projection 1x1, bias col = projection bias
    w3_ref: (Cout, Cmid)   conv3 1x1, BN3 scale folded
    pm_ref: (Cmid, 10)     [BN2 shift | 9 depthwise taps * BN2 scale] (k = kh*3+kw)
    po_ref: (Cout, 1)      BN3 shift
    o_ref : (Cout, N*HW)
    """
    # Reflect-pad boundary masks; per-image lane layout is lane = h*W + w, so
    # the same masks apply to every image slice.
    lane = jax.lax.broadcasted_iota(jnp.int32, (Cmid, HW), 1)
    w_idx = lane % W
    is_w0 = w_idx == 0                 # column w == 0
    is_wL = w_idx == (W - 1)           # column w == W-1
    is_h0 = lane < W                   # row h == 0
    is_hL = lane >= (HW - W)           # row h == H-1

    t2f = pm_ref[:, 0:1]
    t3f = po_ref[:, 0:1]

    # Static unroll over images keeps live tensors at (Cmid, HW) width so the
    # streamed depthwise section fits the 64-vreg file, while weights/params
    # are DMA'd and the pipeline prologue is paid only once.
    for n in range(N):
        sl = slice(n * HW, (n + 1) * HW)          # lane-aligned static slice
        xn = x_ref[:, sl]                                            # (Cin+1, HW)

        # ---- residual projection: park directly in the output VMEM buffer ----
        o_ref[:, sl] = jnp.dot(wp_ref[...], xn,
                               preferred_element_type=jnp.float32)   # (Cout, HW)

        # ---- conv1 (1x1, BN1 fully folded) + ReLU ----
        h1 = jnp.maximum(
            jnp.dot(w1_ref[...], xn, preferred_element_type=jnp.float32), 0.0)

        # ---- reflect-padded 3x3 depthwise conv, streamed tap-by-tap ----
        def w_shifted(dw):
            rp1 = pltpu.roll(h1, 1, axis=1)        # value from (h, w-1), raw
            rm1 = pltpu.roll(h1, HW - 1, axis=1)   # value from (h, w+1), raw
            if dw == -1:
                return jnp.where(is_w0, rm1, rp1)  # reflect at w == 0
            return jnp.where(is_wL, rp1, rm1)      # reflect at w == W-1

        acc = None
        # Process the dw = 0 (center) column last so h1's last use feeds it.
        for dw_idx, col_fn in ((0, lambda: w_shifted(-1)),
                               (2, lambda: w_shifted(+1)),
                               (1, lambda: h1)):
            col = col_fn()
            up_raw = pltpu.roll(col, W, axis=1)        # value from row h-1, raw
            dn_raw = pltpu.roll(col, HW - W, axis=1)   # value from row h+1, raw
            up = jnp.where(is_h0, dn_raw, up_raw)      # reflect at h == 0
            dn = jnp.where(is_hL, up_raw, dn_raw)      # reflect at h == H-1
            top = up * pm_ref[:, 1 + dw_idx:2 + dw_idx]
            acc = top if acc is None else acc + top
            acc = acc + col * pm_ref[:, 4 + dw_idx:5 + dw_idx]
            acc = acc + dn * pm_ref[:, 7 + dw_idx:8 + dw_idx]

        # ---- BN2 shift + ReLU ----
        h2 = jnp.maximum(acc + t2f, 0.0)

        # ---- conv3 (1x1, BN3 scale folded) + shift + ReLU + residual add ----
        h3 = jnp.dot(w3_ref[...], h2, preferred_element_type=jnp.float32)
        o_ref[:, sl] = o_ref[:, sl] + jnp.maximum(h3 + t3f, 0.0)


def resnext_block(x_nchw, kparams):
    """x_nchw: (N, Cin, H, W) float32 -> (N, Cout, H, W) float32."""
    w1s, wps, w3s, p_mid, p_out = kparams
    assert x_nchw.shape == (N, Cin, H, W)

    # Layout plumbing only: channels -> sublanes, all batch pixels -> lanes
    # (lane-dense 512 = 4x128), plus a ones row so the matmuls carry the biases.
    x = jnp.transpose(x_nchw.reshape(N, Cin, HW), (1, 0, 2)).reshape(Cin, NHW)
    x = jnp.concatenate([x, jnp.ones((1, NHW), x.dtype)], axis=0)    # (Cin+1, NHW)

    flops = 2 * NHW * (Cmid * (Cin + 1) + Cout * (Cin + 1) + Cmid * 9 + Cout * Cmid)
    bytes_accessed = 4 * ((Cin + 1) * NHW + Cout * NHW + Cmid * (Cin + 1)
                          + Cout * (Cin + 1) + Cout * Cmid + Cmid * 10 + Cout)

    out = pl.pallas_call(
        resnext_block_kernel,
        out_shape=jax.ShapeDtypeStruct((Cout, NHW), jnp.float32),
        grid=(1,),
        in_specs=[
            pl.BlockSpec((Cin + 1, NHW), lambda i: (0, 0)),
            pl.BlockSpec((Cmid, Cin + 1), lambda i: (0, 0)),
            pl.BlockSpec((Cout, Cin + 1), lambda i: (0, 0)),
            pl.BlockSpec((Cout, Cmid), lambda i: (0, 0)),
            pl.BlockSpec((Cmid, 10), lambda i: (0, 0)),
            pl.BlockSpec((Cout, 1), lambda i: (0, 0)),
        ],
        out_specs=pl.BlockSpec((Cout, NHW), lambda i: (0, 0)),
        compiler_params=pltpu.CompilerParams(dimension_semantics=("arbitrary",)),
        cost_estimate=pl.CostEstimate(flops=flops, transcendentals=0,
                                      bytes_accessed=bytes_accessed),
    )(x, w1s, wps, w3s, p_mid, p_out)

    return jnp.transpose(out.reshape(Cout, N, H, W), (1, 0, 2, 3))


def make_params(key):
    """Deterministic synthetic parameters in 'raw' (per-layer) form."""
    ks = jax.random.split(key, 11)

    def bn_fold(k, c):
        k1, k2, k3, k4 = jax.random.split(k, 4)
        gamma = jax.random.uniform(k1, (c,), minval=0.5, maxval=1.5)
        beta = 0.1 * jax.random.normal(k2, (c,))
        mean = 0.1 * jax.random.normal(k3, (c,))
        var = jax.random.uniform(k4, (c,), minval=0.5, maxval=1.5)
        scale = gamma / jnp.sqrt(var + EPS)
        shift = beta - mean * scale
        return scale, shift

    w1 = 0.1 * jax.random.normal(ks[0], (Cmid, Cin))        # conv1: (Cmid, Cin, 1, 1)
    b1 = 0.1 * jax.random.normal(ks[1], (Cmid,))
    s1, t1 = bn_fold(ks[2], Cmid)
    wd = 0.1 * jax.random.normal(ks[3], (3, 3, Cmid))        # depthwise: (Cmid, 1, 3, 3)
    bd = 0.1 * jax.random.normal(ks[4], (Cmid,))
    s2, t2 = bn_fold(ks[5], Cmid)
    w3 = 0.1 * jax.random.normal(ks[6], (Cout, Cmid))        # conv3: (Cout, Cmid, 1, 1)
    b3 = 0.1 * jax.random.normal(ks[7], (Cout,))
    s3, t3 = bn_fold(ks[8], Cout)
    wp = 0.1 * jax.random.normal(ks[9], (Cout, Cin))         # projection: (Cout, Cin, 1, 1)
    bp = 0.1 * jax.random.normal(ks[10], (Cout,))
    return dict(w1=w1, b1=b1, s1=s1, t1=t1, wd=wd, bd=bd, s2=s2, t2=t2,
                w3=w3, b3=b3, s3=s3, t3=t3, wp=wp, bp=bp)


def pack_params(raw):
    """Fold BN scales into weights, conv biases / BN shifts into bias columns."""
    s1, s2, s3 = raw["s1"], raw["s2"], raw["s3"]
    t1f = raw["b1"] * s1 + raw["t1"]            # BN1 shift with conv1 bias folded
    t2f = raw["bd"] * s2 + raw["t2"]            # BN2 shift with depthwise bias folded
    t3f = raw["b3"] * s3 + raw["t3"]            # BN3 shift with conv3 bias folded

    w1s = jnp.concatenate([raw["w1"] * s1[:, None], t1f[:, None]], axis=1)  # (Cmid, Cin+1)
    wps = jnp.concatenate([raw["wp"], raw["bp"][:, None]], axis=1)          # (Cout, Cin+1)
    w3s = raw["w3"] * s3[:, None]                                           # (Cout, Cmid)
    wd9s = jnp.transpose(raw["wd"], (2, 0, 1)).reshape(Cmid, 9) * s2[:, None]
    p_mid = jnp.concatenate([t2f[:, None], wd9s], axis=1)                   # (Cmid, 10)
    p_out = t3f[:, None]                                                    # (Cout, 1)
    return [w1s, wps, w3s, p_mid, p_out]


def reference(x_nchw, raw):
    """Pure-JAX reference of the same forward pass (unfolded params)."""
    x = jnp.transpose(x_nchw, (0, 2, 3, 1))
    dn = ('NHWC', 'HWIO', 'NHWC')

    def bc(v):
        return v.reshape(1, 1, 1, -1)

    h = jax.lax.conv_general_dilated(x, raw["w1"].T.reshape(1, 1, Cin, Cmid), (1, 1),
                                     'VALID', dimension_numbers=dn) + bc(raw["b1"])
    h = jnp.maximum(h * bc(raw["s1"]) + bc(raw["t1"]), 0.0)
    hpad = jnp.pad(h, ((0, 0), (1, 1), (1, 1), (0, 0)), mode='reflect')
    h = jax.lax.conv_general_dilated(hpad, raw["wd"].reshape(3, 3, 1, Cmid), (1, 1),
                                     'VALID', dimension_numbers=dn,
                                     feature_group_count=Cmid) + bc(raw["bd"])
    h = jnp.maximum(h * bc(raw["s2"]) + bc(raw["t2"]), 0.0)
    h = jax.lax.conv_general_dilated(h, raw["w3"].T.reshape(1, 1, Cmid, Cout), (1, 1),
                                     'VALID', dimension_numbers=dn) + bc(raw["b3"])
    h = jnp.maximum(h * bc(raw["s3"]) + bc(raw["t3"]), 0.0)
    proj = jax.lax.conv_general_dilated(x, raw["wp"].T.reshape(1, 1, Cin, Cout), (1, 1),
                                        'VALID', dimension_numbers=dn) + bc(raw["bp"])
    return jnp.transpose(h + proj, (0, 3, 1, 2))


if __name__ == "__main__":
    key = jax.random.PRNGKey(0)
    kx, kp = jax.random.split(key)
    x = jax.random.normal(kx, (N, Cin, H, W), jnp.float32)   # NCHW like PyTorch
    raw = make_params(kp)
    kparams = pack_params(raw)

    y = resnext_block(x, kparams)
    y = jax.block_until_ready(y)
    assert y.shape == (N, Cout, H, W)

    y_ref = reference(x, raw)
    err = float(jnp.max(jnp.abs(y - y_ref)))
    assert jnp.allclose(y, y_ref, rtol=1e-4, atol=1e-4), f"max abs err = {err}"

    print("KERNEL_OK")
</pallas_src>

<mosaic_0001>
module attributes {stable_mosaic.version = 11 : i64} {
  func.func @resnext_block_kernel(%arg0: i32, %arg1: memref<17x512xf32, #tpu.memory_space<vmem>>, %arg2: memref<32x17xf32, #tpu.memory_space<vmem>>, %arg3: memref<64x17xf32, #tpu.memory_space<vmem>>, %arg4: memref<64x32xf32, #tpu.memory_space<vmem>>, %arg5: memref<32x10xf32, #tpu.memory_space<vmem>>, %arg6: memref<64x1xf32, #tpu.memory_space<vmem>>, %arg7: memref<64x512xf32, #tpu.memory_space<vmem>>) attributes {dimension_semantics = [#tpu.dimension_semantics<arbitrary>], iteration_bounds = array<i64: 1>, scalar_prefetch = 0 : i64, scratch_operands = 0 : i64, tpu.core_type = #tpu.core_type<tc>, window_params = [{pipeline_mode = #tpu.pipeline_mode<synchronous>, transform_indices = @transform_0, window_bounds = array<i64: 17, 512>}, {pipeline_mode = #tpu.pipeline_mode<synchronous>, transform_indices = @transform_1, window_bounds = array<i64: 32, 17>}, {pipeline_mode = #tpu.pipeline_mode<synchronous>, transform_indices = @transform_2, window_bounds = array<i64: 64, 17>}, {pipeline_mode = #tpu.pipeline_mode<synchronous>, transform_indices = @transform_3, window_bounds = array<i64: 64, 32>}, {pipeline_mode = #tpu.pipeline_mode<synchronous>, transform_indices = @transform_4, window_bounds = array<i64: 32, 10>}, {pipeline_mode = #tpu.pipeline_mode<synchronous>, transform_indices = @transform_5, window_bounds = array<i64: 64, 1>}, {pipeline_mode = #tpu.pipeline_mode<synchronous>, transform_indices = @transform_6, window_bounds = array<i64: 64, 512>}]} {
    %0 = tpu.iota {dimensions = array<i32: 1>} : vector<32x256xi32>
    %c16_i32 = arith.constant 16 : i32
    %c0_i32 = arith.constant 0 : i32
    %1 = arith.cmpi eq, %c16_i32, %c0_i32 : i32
    %c1_i32 = arith.constant 1 : i32
    %2 = arith.select %1, %c1_i32, %c16_i32 : i32
    %3 = vector.broadcast %2 : i32 to vector<32x256xi32>
    %4 = arith.remsi %0, %3 : vector<32x256xi32>
    %c0_i32_0 = arith.constant 0 : i32
    %5 = vector.broadcast %c0_i32_0 : i32 to vector<32x256xi32>
    %6 = arith.cmpi ne, %4, %5 : vector<32x256xi32>
    %c0_i32_1 = arith.constant 0 : i32
    %7 = vector.broadcast %c0_i32_1 : i32 to vector<32x256xi32>
    %8 = arith.cmpi slt, %4, %7 : vector<32x256xi32>
    %c0_i32_2 = arith.constant 0 : i32
    %9 = arith.cmpi slt, %2, %c0_i32_2 : i32
    %10 = vector.broadcast %9 : i1 to vector<32x256xi1>
    %11 = vector.broadcast %10 : vector<32x256xi1> to vector<32x256xi1>
    %12 = arith.xori %8, %11 : vector<32x256xi1>
    %13 = arith.andi %12, %6 : vector<32x256xi1>
    %14 = vector.broadcast %2 : i32 to vector<32x256xi32>
    %15 = arith.addi %4, %14 : vector<32x256xi32>
    %16 = arith.select %13, %15, %4 : vector<32x256xi1>, vector<32x256xi32>
    %c0_i32_3 = arith.constant 0 : i32
    %17 = vector.broadcast %c0_i32_3 : i32 to vector<32x256xi32>
    %18 = arith.cmpi eq, %16, %17 : vector<32x256xi32>
    %c15_i32 = arith.constant 15 : i32
    %19 = vector.broadcast %c15_i32 : i32 to vector<32x256xi32>
    %20 = arith.cmpi eq, %16, %19 : vector<32x256xi32>
    %c16_i32_4 = arith.constant 16 : i32
    %21 = vector.broadcast %c16_i32_4 : i32 to vector<32x256xi32>
    %22 = arith.cmpi slt, %0, %21 : vector<32x256xi32>
    %c240_i32 = arith.constant 240 : i32
    %23 = vector.broadcast %c240_i32 : i32 to vector<32x256xi32>
    %24 = arith.cmpi sge, %0, %23 : vector<32x256xi32>
    %c0 = arith.constant 0 : index
    %c0_5 = arith.constant 0 : index
    %25 = vector.load %arg5[%c0, %c0_5] : memref<32x10xf32, #tpu.memory_space<vmem>>, vector<32x1xf32>
    %c0_6 = arith.constant 0 : index
    %c0_7 = arith.constant 0 : index
    %26 = vector.load %arg6[%c0_6, %c0_7] : memref<64x1xf32, #tpu.memory_space<vmem>>, vector<64x1xf32>
    %c0_8 = arith.constant 0 : index
    %c0_9 = arith.constant 0 : index
    %27 = vector.load %arg1[%c0_8, %c0_9] : memref<17x512xf32, #tpu.memory_space<vmem>>, vector<17x256xf32>
    %c0_10 = arith.constant 0 : index
    %c0_11 = arith.constant 0 : index
    %28 = vector.load %arg3[%c0_10, %c0_11] : memref<64x17xf32, #tpu.memory_space<vmem>>, vector<64x17xf32>
    %cst = arith.constant dense<0.000000e+00> : vector<64x256xf32>
    %29 = tpu.matmul %28, %27, %cst {dimension_numbers = #tpu.dot_dimension_numbers<[1], [0], [0], [1], [0, 0, 1, 1], [], []>} : vector<64x17xf32>, vector<17x256xf32>, vector<64x256xf32> -> vector<64x256xf32>
    %c0_12 = arith.constant 0 : index
    %c0_13 = arith.constant 0 : index
    %30 = vector.load %arg7[%c0_12, %c0_13] : memref<64x512xf32, #tpu.memory_space<vmem>>, vector<64x256xf32>
    tpu.vector_store %arg7[%c0_12, %c0_13], %29 {strides = array<i32>} : memref<64x512xf32, #tpu.memory_space<vmem>>, vector<64x256xf32>,
    %c0_14 = arith.constant 0 : index
    %c0_15 = arith.constant 0 : index
    %31 = vector.load %arg2[%c0_14, %c0_15] : memref<32x17xf32, #tpu.memory_space<vmem>>, vector<32x17xf32>
    %cst_16 = arith.constant dense<0.000000e+00> : vector<32x256xf32>
    %32 = tpu.matmul %31, %27, %cst_16 {dimension_numbers = #tpu.dot_dimension_numbers<[1], [0], [0], [1], [0, 0, 1, 1], [], []>} : vector<32x17xf32>, vector<17x256xf32>, vector<32x256xf32> -> vector<32x256xf32>
    %cst_17 = arith.constant 0.000000e+00 : f32
    %33 = vector.broadcast %cst_17 : f32 to vector<32x256xf32>
    %34 = arith.maximumf %32, %33 : vector<32x256xf32>
    %c1_i32_18 = arith.constant 1 : i32
    %35 = tpu.dynamic_rotate %34 by %c1_i32_18 dim 1 : vector<32x256xf32>, i32 -> vector<32x256xf32>
    %c255_i32 = arith.constant 255 : i32
    %36 = tpu.dynamic_rotate %34 by %c255_i32 dim 1 : vector<32x256xf32>, i32 -> vector<32x256xf32>
    %37 = arith.select %18, %36, %35 : vector<32x256xi1>, vector<32x256xf32>
    %c16_i32_19 = arith.constant 16 : i32
    %38 = tpu.dynamic_rotate %37 by %c16_i32_19 dim 1 : vector<32x256xf32>, i32 -> vector<32x256xf32>
    %c240_i32_20 = arith.constant 240 : i32
    %39 = tpu.dynamic_rotate %37 by %c240_i32_20 dim 1 : vector<32x256xf32>, i32 -> vector<32x256xf32>
    %40 = arith.select %22, %39, %38 : vector<32x256xi1>, vector<32x256xf32>
    %41 = arith.select %24, %38, %39 : vector<32x256xi1>, vector<32x256xf32>
    %c0_21 = arith.constant 0 : index
    %c1 = arith.constant 1 : index
    %42 = vector.load %arg5[%c0_21, %c1] : memref<32x10xf32, #tpu.memory_space<vmem>>, vector<32x1xf32>
    %43 = vector.broadcast %42 : vector<32x1xf32> to vector<32x256xf32>
    %44 = arith.mulf %40, %43 : vector<32x256xf32>
    %c0_22 = arith.constant 0 : index
    %c4 = arith.constant 4 : index
    %45 = vector.load %arg5[%c0_22, %c4] : memref<32x10xf32, #tpu.memory_space<vmem>>, vector<32x1xf32>
    %46 = vector.broadcast %45 : vector<32x1xf32> to vector<32x256xf32>
    %47 = arith.mulf %37, %46 : vector<32x256xf32>
    %48 = arith.addf %44, %47 : vector<32x256xf32>
    %c0_23 = arith.constant 0 : index
    %c7 = arith.constant 7 : index
    %49 = vector.load %arg5[%c0_23, %c7] : memref<32x10xf32, #tpu.memory_space<vmem>>, vector<32x1xf32>
    %50 = vector.broadcast %49 : vector<32x1xf32> to vector<32x256xf32>
    %51 = arith.mulf %41, %50 : vector<32x256xf32>
    %52 = arith.addf %48, %51 : vector<32x256xf32>
    %c1_i32_24 = arith.constant 1 : i32
    %53 = tpu.dynamic_rotate %34 by %c1_i32_24 dim 1 : vector<32x256xf32>, i32 -> vector<32x256xf32>
    %c255_i32_25 = arith.constant 255 : i32
    %54 = tpu.dynamic_rotate %34 by %c255_i32_25 dim 1 : vector<32x256xf32>, i32 -> vector<32x256xf32>
    %55 = arith.select %20, %53, %54 : vector<32x256xi1>, vector<32x256xf32>
    %c16_i32_26 = arith.constant 16 : i32
    %56 = tpu.dynamic_rotate %55 by %c16_i32_26 dim 1 : vector<32x256xf32>, i32 -> vector<32x256xf32>
    %c240_i32_27 = arith.constant 240 : i32
    %57 = tpu.dynamic_rotate %55 by %c240_i32_27 dim 1 : vector<32x256xf32>, i32 -> vector<32x256xf32>
    %58 = arith.select %22, %57, %56 : vector<32x256xi1>, vector<32x256xf32>
    %59 = arith.select %24, %56, %57 : vector<32x256xi1>, vector<32x256xf32>
    %c0_28 = arith.constant 0 : index
    %c3 = arith.constant 3 : index
    %60 = vector.load %arg5[%c0_28, %c3] : memref<32x10xf32, #tpu.memory_space<vmem>>, vector<32x1xf32>
    %61 = vector.broadcast %60 : vector<32x1xf32> to vector<32x256xf32>
    %62 = arith.mulf %58, %61 : vector<32x256xf32>
    %63 = arith.addf %52, %62 : vector<32x256xf32>
    %c0_29 = arith.constant 0 : index
    %c6 = arith.constant 6 : index
    %64 = vector.load %arg5[%c0_29, %c6] : memref<32x10xf32, #tpu.memory_space<vmem>>, vector<32x1xf32>
    %65 = vector.broadcast %64 : vector<32x1xf32> to vector<32x256xf32>
    %66 = arith.mulf %55, %65 : vector<32x256xf32>
    %67 = arith.addf %63, %66 : vector<32x256xf32>
    %c0_30 = arith.constant 0 : index
    %c9 = arith.constant 9 : index
    %68 = vector.load %arg5[%c0_30, %c9] : memref<32x10xf32, #tpu.memory_space<vmem>>, vector<32x1xf32>
    %69 = vector.broadcast %68 : vector<32x1xf32> to vector<32x256xf32>
    %70 = arith.mulf %59, %69 : vector<32x256xf32>
    %71 = arith.addf %67, %70 : vector<32x256xf32>
    %c16_i32_31 = arith.constant 16 : i32
    %72 = tpu.dynamic_rotate %34 by %c16_i32_31 dim 1 : vector<32x256xf32>, i32 -> vector<32x256xf32>
    %c240_i32_32 = arith.constant 240 : i32
    %73 = tpu.dynamic_rotate %34 by %c240_i32_32 dim 1 : vector<32x256xf32>, i32 -> vector<32x256xf32>
    %74 = arith.select %22, %73, %72 : vector<32x256xi1>, vector<32x256xf32>
    %75 = arith.select %24, %72, %73 : vector<32x256xi1>, vector<32x256xf32>
    %c0_33 = arith.constant 0 : index
    %c2 = arith.constant 2 : index
    %76 = vector.load %arg5[%c0_33, %c2] : memref<32x10xf32, #tpu.memory_space<vmem>>, vector<32x1xf32>
    %77 = vector.broadcast %76 : vector<32x1xf32> to vector<32x256xf32>
    %78 = arith.mulf %74, %77 : vector<32x256xf32>
    %79 = arith.addf %71, %78 : vector<32x256xf32>
    %c0_34 = arith.constant 0 : index
    %c5 = arith.constant 5 : index
    %80 = vector.load %arg5[%c0_34, %c5] : memref<32x10xf32, #tpu.memory_space<vmem>>, vector<32x1xf32>
    %81 = vector.broadcast %80 : vector<32x1xf32> to vector<32x256xf32>
    %82 = arith.mulf %34, %81 : vector<32x256xf32>
    %83 = arith.addf %79, %82 : vector<32x256xf32>
    %c0_35 = arith.constant 0 : index
    %c8 = arith.constant 8 : index
    %84 = vector.load %arg5[%c0_35, %c8] : memref<32x10xf32, #tpu.memory_space<vmem>>, vector<32x1xf32>
    %85 = vector.broadcast %84 : vector<32x1xf32> to vector<32x256xf32>
    %86 = arith.mulf %75, %85 : vector<32x256xf32>
    %87 = arith.addf %83, %86 : vector<32x256xf32>
    %88 = vector.broadcast %25 : vector<32x1xf32> to vector<32x256xf32>
    %89 = arith.addf %87, %88 : vector<32x256xf32>
    %cst_36 = arith.constant 0.000000e+00 : f32
    %90 = vector.broadcast %cst_36 : f32 to vector<32x256xf32>
    %91 = arith.maximumf %89, %90 : vector<32x256xf32>
    %c0_37 = arith.constant 0 : index
    %c0_38 = arith.constant 0 : index
    %92 = vector.load %arg4[%c0_37, %c0_38] : memref<64x32xf32, #tpu.memory_space<vmem>>, vector<64x32xf32>
    %cst_39 = arith.constant dense<0.000000e+00> : vector<64x256xf32>
    %93 = tpu.matmul %92, %91, %cst_39 {dimension_numbers = #tpu.dot_dimension_numbers<[1], [0], [0], [1], [0, 0, 1, 1], [], []>} : vector<64x32xf32>, vector<32x256xf32>, vector<64x256xf32> -> vector<64x256xf32>
    %c0_40 = arith.constant 0 : index
    %c0_41 = arith.constant 0 : index
    %94 = vector.load %arg7[%c0_40, %c0_41] : memref<64x512xf32, #tpu.memory_space<vmem>>, vector<64x256xf32>
    %95 = vector.broadcast %26 : vector<64x1xf32> to vector<64x256xf32>
    %96 = arith.addf %93, %95 : vector<64x256xf32>
    %cst_42 = arith.constant 0.000000e+00 : f32
    %97 = vector.broadcast %cst_42 : f32 to vector<64x256xf32>
    %98 = arith.maximumf %96, %97 : vector<64x256xf32>
    %99 = arith.addf %94, %98 : vector<64x256xf32>
    %c0_43 = arith.constant 0 : index
    %c0_44 = arith.constant 0 : index
    %100 = vector.load %arg7[%c0_43, %c0_44] : memref<64x512xf32, #tpu.memory_space<vmem>>, vector<64x256xf32>
    tpu.vector_store %arg7[%c0_43, %c0_44], %99 {strides = array<i32>} : memref<64x512xf32, #tpu.memory_space<vmem>>, vector<64x256xf32>,
    %c0_45 = arith.constant 0 : index
    %c256 = arith.constant 256 : index
    %101 = vector.load %arg1[%c0_45, %c256] : memref<17x512xf32, #tpu.memory_space<vmem>>, vector<17x256xf32>
    %c0_46 = arith.constant 0 : index
    %c0_47 = arith.constant 0 : index
    %102 = vector.load %arg3[%c0_46, %c0_47] : memref<64x17xf32, #tpu.memory_space<vmem>>, vector<64x17xf32>
    %cst_48 = arith.constant dense<0.000000e+00> : vector<64x256xf32>
    %103 = tpu.matmul %102, %101, %cst_48 {dimension_numbers = #tpu.dot_dimension_numbers<[1], [0], [0], [1], [0, 0, 1, 1], [], []>} : vector<64x17xf32>, vector<17x256xf32>, vector<64x256xf32> -> vector<64x256xf32>
    %c0_49 = arith.constant 0 : index
    %c256_50 = arith.constant 256 : index
    %104 = vector.load %arg7[%c0_49, %c256_50] : memref<64x512xf32, #tpu.memory_space<vmem>>, vector<64x256xf32>
    tpu.vector_store %arg7[%c0_49, %c256_50], %103 {strides = array<i32>} : memref<64x512xf32, #tpu.memory_space<vmem>>, vector<64x256xf32>,
    %c0_51 = arith.constant 0 : index
    %c0_52 = arith.constant 0 : index
    %105 = vector.load %arg2[%c0_51, %c0_52] : memref<32x17xf32, #tpu.memory_space<vmem>>, vector<32x17xf32>
    %cst_53 = arith.constant dense<0.000000e+00> : vector<32x256xf32>
    %106 = tpu.matmul %105, %101, %cst_53 {dimension_numbers = #tpu.dot_dimension_numbers<[1], [0], [0], [1], [0, 0, 1, 1], [], []>} : vector<32x17xf32>, vector<17x256xf32>, vector<32x256xf32> -> vector<32x256xf32>
    %cst_54 = arith.constant 0.000000e+00 : f32
    %107 = vector.broadcast %cst_54 : f32 to vector<32x256xf32>
    %108 = arith.maximumf %106, %107 : vector<32x256xf32>
    %c1_i32_55 = arith.constant 1 : i32
    %109 = tpu.dynamic_rotate %108 by %c1_i32_55 dim 1 : vector<32x256xf32>, i32 -> vector<32x256xf32>
    %c255_i32_56 = arith.constant 255 : i32
    %110 = tpu.dynamic_rotate %108 by %c255_i32_56 dim 1 : vector<32x256xf32>, i32 -> vector<32x256xf32>
    %111 = arith.select %18, %110, %109 : vector<32x256xi1>, vector<32x256xf32>
    %c16_i32_57 = arith.constant 16 : i32
    %112 = tpu.dynamic_rotate %111 by %c16_i32_57 dim 1 : vector<32x256xf32>, i32 -> vector<32x256xf32>
    %c240_i32_58 = arith.constant 240 : i32
    %113 = tpu.dynamic_rotate %111 by %c240_i32_58 dim 1 : vector<32x256xf32>, i32 -> vector<32x256xf32>
    %114 = arith.select %22, %113, %112 : vector<32x256xi1>, vector<32x256xf32>
    %115 = arith.select %24, %112, %113 : vector<32x256xi1>, vector<32x256xf32>
    %c0_59 = arith.constant 0 : index
    %c1_60 = arith.constant 1 : index
    %116 = vector.load %arg5[%c0_59, %c1_60] : memref<32x10xf32, #tpu.memory_space<vmem>>, vector<32x1xf32>
    %117 = vector.broadcast %116 : vector<32x1xf32> to vector<32x256xf32>
    %118 = arith.mulf %114, %117 : vector<32x256xf32>
    %c0_61 = arith.constant 0 : index
    %c4_62 = arith.constant 4 : index
    %119 = vector.load %arg5[%c0_61, %c4_62] : memref<32x10xf32, #tpu.memory_space<vmem>>, vector<32x1xf32>
    %120 = vector.broadcast %119 : vector<32x1xf32> to vector<32x256xf32>
    %121 = arith.mulf %111, %120 : vector<32x256xf32>
    %122 = arith.addf %118, %121 : vector<32x256xf32>
    %c0_63 = arith.constant 0 : index
    %c7_64 = arith.constant 7 : index
    %123 = vector.load %arg5[%c0_63, %c7_64] : memref<32x10xf32, #tpu.memory_space<vmem>>, vector<32x1xf32>
    %124 = vector.broadcast %123 : vector<32x1xf32> to vector<32x256xf32>
    %125 = arith.mulf %115, %124 : vector<32x256xf32>
    %126 = arith.addf %122, %125 : vector<32x256xf32>
    %c1_i32_65 = arith.constant 1 : i32
    %127 = tpu.dynamic_rotate %108 by %c1_i32_65 dim 1 : vector<32x256xf32>, i32 -> vector<32x256xf32>
    %c255_i32_66 = arith.constant 255 : i32
    %128 = tpu.dynamic_rotate %108 by %c255_i32_66 dim 1 : vector<32x256xf32>, i32 -> vector<32x256xf32>
    %129 = arith.select %20, %127, %128 : vector<32x256xi1>, vector<32x256xf32>
    %c16_i32_67 = arith.constant 16 : i32
    %130 = tpu.dynamic_rotate %129 by %c16_i32_67 dim 1 : vector<32x256xf32>, i32 -> vector<32x256xf32>
    %c240_i32_68 = arith.constant 240 : i32
    %131 = tpu.dynamic_rotate %129 by %c240_i32_68 dim 1 : vector<32x256xf32>, i32 -> vector<32x256xf32>
    %132 = arith.select %22, %131, %130 : vector<32x256xi1>, vector<32x256xf32>
    %133 = arith.select %24, %130, %131 : vector<32x256xi1>, vector<32x256xf32>
    %c0_69 = arith.constant 0 : index
    %c3_70 = arith.constant 3 : index
    %134 = vector.load %arg5[%c0_69, %c3_70] : memref<32x10xf32, #tpu.memory_space<vmem>>, vector<32x1xf32>
    %135 = vector.broadcast %134 : vector<32x1xf32> to vector<32x256xf32>
    %136 = arith.mulf %132, %135 : vector<32x256xf32>
    %137 = arith.addf %126, %136 : vector<32x256xf32>
    %c0_71 = arith.constant 0 : index
    %c6_72 = arith.constant 6 : index
    %138 = vector.load %arg5[%c0_71, %c6_72] : memref<32x10xf32, #tpu.memory_space<vmem>>, vector<32x1xf32>
    %139 = vector.broadcast %138 : vector<32x1xf32> to vector<32x256xf32>
    %140 = arith.mulf %129, %139 : vector<32x256xf32>
    %141 = arith.addf %137, %140 : vector<32x256xf32>
    %c0_73 = arith.constant 0 : index
    %c9_74 = arith.constant 9 : index
    %142 = vector.load %arg5[%c0_73, %c9_74] : memref<32x10xf32, #tpu.memory_space<vmem>>, vector<32x1xf32>
    %143 = vector.broadcast %142 : vector<32x1xf32> to vector<32x256xf32>
    %144 = arith.mulf %133, %143 : vector<32x256xf32>
    %145 = arith.addf %141, %144 : vector<32x256xf32>
    %c16_i32_75 = arith.constant 16 : i32
    %146 = tpu.dynamic_rotate %108 by %c16_i32_75 dim 1 : vector<32x256xf32>, i32 -> vector<32x256xf32>
    %c240_i32_76 = arith.constant 240 : i32
    %147 = tpu.dynamic_rotate %108 by %c240_i32_76 dim 1 : vector<32x256xf32>, i32 -> vector<32x256xf32>
    %148 = arith.select %22, %147, %146 : vector<32x256xi1>, vector<32x256xf32>
    %149 = arith.select %24, %146, %147 : vector<32x256xi1>, vector<32x256xf32>
    %c0_77 = arith.constant 0 : index
    %c2_78 = arith.constant 2 : index
    %150 = vector.load %arg5[%c0_77, %c2_78] : memref<32x10xf32, #tpu.memory_space<vmem>>, vector<32x1xf32>
    %151 = vector.broadcast %150 : vector<32x1xf32> to vector<32x256xf32>
    %152 = arith.mulf %148, %151 : vector<32x256xf32>
    %153 = arith.addf %145, %152 : vector<32x256xf32>
    %c0_79 = arith.constant 0 : index
    %c5_80 = arith.constant 5 : index
    %154 = vector.load %arg5[%c0_79, %c5_80] : memref<32x10xf32, #tpu.memory_space<vmem>>, vector<32x1xf32>
    %155 = vector.broadcast %154 : vector<32x1xf32> to vector<32x256xf32>
    %156 = arith.mulf %108, %155 : vector<32x256xf32>
    %157 = arith.addf %153, %156 : vector<32x256xf32>
    %c0_81 = arith.constant 0 : index
    %c8_82 = arith.constant 8 : index
    %158 = vector.load %arg5[%c0_81, %c8_82] : memref<32x10xf32, #tpu.memory_space<vmem>>, vector<32x1xf32>
    %159 = vector.broadcast %158 : vector<32x1xf32> to vector<32x256xf32>
    %160 = arith.mulf %149, %159 : vector<32x256xf32>
    %161 = arith.addf %157, %160 : vector<32x256xf32>
    %162 = vector.broadcast %25 : vector<32x1xf32> to vector<32x256xf32>
    %163 = arith.addf %161, %162 : vector<32x256xf32>
    %cst_83 = arith.constant 0.000000e+00 : f32
    %164 = vector.broadcast %cst_83 : f32 to vector<32x256xf32>
    %165 = arith.maximumf %163, %164 : vector<32x256xf32>
    %c0_84 = arith.constant 0 : index
    %c0_85 = arith.constant 0 : index
    %166 = vector.load %arg4[%c0_84, %c0_85] : memref<64x32xf32, #tpu.memory_space<vmem>>, vector<64x32xf32>
    %cst_86 = arith.constant dense<0.000000e+00> : vector<64x256xf32>
    %167 = tpu.matmul %166, %165, %cst_86 {dimension_numbers = #tpu.dot_dimension_numbers<[1], [0], [0], [1], [0, 0, 1, 1], [], []>} : vector<64x32xf32>, vector<32x256xf32>, vector<64x256xf32> -> vector<64x256xf32>
    %c0_87 = arith.constant 0 : index
    %c256_88 = arith.constant 256 : index
    %168 = vector.load %arg7[%c0_87, %c256_88] : memref<64x512xf32, #tpu.memory_space<vmem>>, vector<64x256xf32>
    %169 = vector.broadcast %26 : vector<64x1xf32> to vector<64x256xf32>
    %170 = arith.addf %167, %169 : vector<64x256xf32>
    %cst_89 = arith.constant 0.000000e+00 : f32
    %171 = vector.broadcast %cst_89 : f32 to vector<64x256xf32>
    %172 = arith.maximumf %170, %171 : vector<64x256xf32>
    %173 = arith.addf %168, %172 : vector<64x256xf32>
    %c0_90 = arith.constant 0 : index
    %c256_91 = arith.constant 256 : index
    %174 = vector.load %arg7[%c0_90, %c256_91] : memref<64x512xf32, #tpu.memory_space<vmem>>, vector<64x256xf32>
    tpu.vector_store %arg7[%c0_90, %c256_91], %173 {strides = array<i32>} : memref<64x512xf32, #tpu.memory_space<vmem>>, vector<64x256xf32>,
    return
  }
  func.func @transform_0(%arg0: i32) -> (i32, i32) {
    %c0_i32 = arith.constant 0 : i32
    %c0_i32_0 = arith.constant 0 : i32
    %c0_i32_1 = arith.constant 0 : i32
    return %c0_i32, %c0_i32_0 : i32, i32
  }
  func.func @transform_1(%arg0: i32) -> (i32, i32) {
    %c0_i32 = arith.constant 0 : i32
    %c0_i32_0 = arith.constant 0 : i32
    %c0_i32_1 = arith.constant 0 : i32
    return %c0_i32, %c0_i32_0 : i32, i32
  }
  func.func @transform_2(%arg0: i32) -> (i32, i32) {
    %c0_i32 = arith.constant 0 : i32
    %c0_i32_0 = arith.constant 0 : i32
    %c0_i32_1 = arith.constant 0 : i32
    return %c0_i32, %c0_i32_0 : i32, i32
  }
  func.func @transform_3(%arg0: i32) -> (i32, i32) {
    %c0_i32 = arith.constant 0 : i32
    %c0_i32_0 = arith.constant 0 : i32
    %c0_i32_1 = arith.constant 0 : i32
    return %c0_i32, %c0_i32_0 : i32, i32
  }
  func.func @transform_4(%arg0: i32) -> (i32, i32) {
    %c0_i32 = arith.constant 0 : i32
    %c0_i32_0 = arith.constant 0 : i32
    %c0_i32_1 = arith.constant 0 : i32
    return %c0_i32, %c0_i32_0 : i32, i32
  }
  func.func @transform_5(%arg0: i32) -> (i32, i32) {
    %c0_i32 = arith.constant 0 : i32
    %c0_i32_0 = arith.constant 0 : i32
    %c0_i32_1 = arith.constant 0 : i32
    return %c0_i32, %c0_i32_0 : i32, i32
  }
  func.func @transform_6(%arg0: i32) -> (i32, i32) {
    %c0_i32 = arith.constant 0 : i32
    %c0_i32_0 = arith.constant 0 : i32
    %c0_i32_1 = arith.constant 0 : i32
    return %c0_i32, %c0_i32_0 : i32, i32
  }
}

</mosaic_0001>

<bundles_post_ra>
// kernel: tpu_custom_call.1
= control target key start
LH: loop header
LB: loop body
LE: loop exit
PB: predicated region body
PF: predicated region fallthrough
CT: control target
= control target key end

     0   :  { %v4417_v5 = vmov 0.0   ;;  %vm110_vm0 = vcmask 1040384   ;;  %v4437_v8 = vmov 1   ;;  %vm85_vm1 = vcmask 138240   ;;  %s4410_s0 = inlined_call_operand.vmem [shape: f32[17,512], index: 0, kind: input, shape index: {}]   ;;  %s4411_s1 = inlined_call_operand.vmem [shape: f32[32,17], index: 1, kind: input, shape index: {}]   ;;  %s4412_s2 = inlined_call_operand.vmem [shape: f32[64,17], index: 2, kind: input, shape index: {}]   ;;  %s4413_s3 = inlined_call_operand.vmem [shape: f32[64,32], index: 3, kind: input, shape index: {}]   ;;  %s4414_s4 = inlined_call_operand.vmem [shape: f32[32,10], index: 4, kind: input, shape index: {}]   ;;  %s4415_s5 = inlined_call_operand.vmem [shape: f32[64,1], index: 5, kind: input, shape index: {}]   ;;  %s4416_s6 = inlined_call_operand.hbm [shape: f32[64,512], index: 6, kind: output, shape index: {}]  }
   0x1   :  { %v72_v0 = vld [vmem:[%s4410_s0 + $0x8] sm:$0xff]  ;;  %v71_v2 = vld [vmem:[%s4410_s0] sm:$0xff]  ;;  %205 = vmatprep.mubr.f32.mxu1 %v4417_v5  ;;  %181 = vmatprep.mubr.f32.mxu0 %v4417_v5 }
   0x2   :  { %v74_v1 = vld [vmem:[%s4410_s0 + $0x28] sm:$0xff]  ;;  %v73_v4 = vld [vmem:[%s4410_s0 + $0x20] sm:$0xff]  ;;  %2366 = vset.pattern.permute.xlu1 %v4437_v8  ;;  %2365 = vset.pattern.permute.xlu0 %v4437_v8 }
   0x3   :  { %v2311_v3 = vpack.c.bf16 %v74_v1, %v72_v0  ;;  %v2313_v6 = vpack.c.bf16 %v73_v4, %v71_v2  ;;  %v76_v7 = vld [vmem:[%s4410_s0 + $0x48] sm:$0x1]  ;;  %v2527_v10 = vld [vmem:[%s4414_s4] sm:$0xff] }
   0x4   :  { %v2521_v9 = vld [vmem:[%s4414_s4 + $0x8] sm:$0xff]  ;;  %v75_v11 = vld [vmem:[%s4410_s0 + $0x40] sm:$0x1]  ;;  %488 = vperm.xlu0 %2365, %v2527_v10  }
   0x5   :  { %2343 = vmatprep.subr.bf16.mxu1 %v2311_v3  ;;  %2312 = vmatprep.subr.bf16.mxu0 %v2311_v3  ;;  %v81_v12 = vld [vmem:[%s4412_s2 + $0x20] sm:$0xff] }
   0x6   :  { %2345 = vmatpush1.bf16.msra.mxu1 %v2313_v6  ;;  %493 = vperm.xlu1 %2366, %v2521_v9  }
   0x7   :  { %2344 = vmatprep.subr.msk.mxu1 %vm110_vm0, %v76_v7  ;;  %2314 = vmatpush1.bf16.msra.mxu0 %v2313_v6 }
   0x8   :  { %11 = vsyncpa [#allocation3], 0  ;;  %2263 = vmatprep.subr.msk.mxu0 %vm110_vm0, %v76_v7  ;;  %v4435_v13 = vmov 4   ;;  %v82_v14 = vld [vmem:[%s4412_s2 + $0x28] sm:$0xff]  ;;  %v2550_v15 = vld [vmem:[%s4414_s4 + $0x10] sm:$0xff]  ;;  %v4433_v17 = vmov 7  }
   0x9   :  { %498 = vperm.xlu0 %2365, %v2550_v15   ;;  %v83_v16 = vld [vmem:[%s4412_s2 + $0x30] sm:$0xff]  ;;  %v84_v18 = vld [vmem:[%s4412_s2 + $0x38] sm:$0xff]  ;;  %v246_v20 = vld [vmem:[%s4411_s1] sm:$0xff]  ;;  %v4427_v23 = vmov 6   ;;  %v4431_v24 = vmov 3   ;;  %v4429_v26 = vmov 9  }
   0xa   :  { %2346 = vmatpush1.msk.msra.mxu1 %vm110_vm0, %v75_v11  ;;  %2367 = vset.pattern.permute.xlu1 %v4435_v13  ;;  %v2573_v19 = vld [vmem:[%s4414_s4 + $0x18] sm:$0xff]  ;;  %v247_v21 = vld [vmem:[%s4411_s1 + $0x8] sm:$0xff]  ;;  %v248_v22 = vld [vmem:[%s4411_s1 + $0x10] sm:$0xff]  ;;  %v4425_v27 = vmov 2   ;;  %v4423_v28 = vmov 5   ;;  %v4421_v29 = vmov 8  }
   0xb   :  { %2269 = vmatmul.mubr.msk.f32.vlgmr.msra.gmra.mrb[0].mxu1 %vm85_vm1, %v81_v12  ;;  %2316 = vmatprep.subr.bf16.mxu1 %v2311_v3  ;;  %v249_v25 = vld [vmem:[%s4411_s1 + $0x18] sm:$0xff]  ;;  %v4419_v30 = vmov 0   ;;  %s2457_s9 = smov 1   ;;  %s2458_s10 = smov 16   ;;  %vm1006_vm11 = vcmask 261120  }
   0xc   :  { %211 = vmatprep.mubr.f32.mxu1 %v4417_v5  ;;  %2318 = vmatpush1.bf16.msra.mxu1 %v2313_v6  ;;  %s2459_s11 = smov 127   ;;  %s2460_s12 = smov 112  }
   0xd   :  { %2273 = vmatprep.subr.msk.mxu1 %vm110_vm0, %v76_v7  ;;  %515 = vperm.xlu1 %2367, %v2527_v10  }
   0xe   :  { %2264 = vmatpush1.msk.msra.mxu0 %vm110_vm0, %v75_v11  ;;  %2369 = vset.pattern.permute.xlu0 %v4435_v13 }
   0xf   :  { %2270 = vmatmul.mubr.msk.f32.gmra.mrb[2].mxu1 %vm85_vm1, %v82_v14  ;;  %519 = vperm.xlu0 %2369, %v2521_v9  }
  0x10   :  { %217 = vmatprep.mubr.f32.mxu1 %v4417_v5  ;;  %2274 = vmatpush1.msk.msra.mxu1 %vm110_vm0, %v75_v11 }
  0x11   :  { %2368 = vset.pattern.permute.xlu1 %v4433_v17 }
  0x12   :  { %547 = vperm.xlu1 %2368, %v2527_v10  }
  0x13   :  { %2271 = vmatmul.mubr.msk.f32.gmra.mrb[4].mxu1 %vm85_vm1, %v83_v16  ;;  %527 = vperm.xlu0 %2369, %v2573_v19  }
  0x14   :  { %223 = vmatprep.mubr.f32.mxu1 %v4417_v5 }
  0x16   :  { %551 = vperm.xlu1 %2368, %v2521_v9  }
  0x17   :  { %2272 = vmatmul.mubr.msk.f32.gmra.mrb[6].mxu1 %vm85_vm1, %v84_v18  ;;  %2373 = vset.pattern.permute.xlu0 %v4433_v17 }
  0x18   :  { %326 = vmatprep.mubr.f32.mxu1 %v4417_v5  ;;  %555 = vperm.xlu0 %2373, %v2550_v15  }
  0x1a   :  { %2370 = vset.pattern.permute.xlu1 %v4437_v8 }
  0x1b   :  { %2275 = vmatmul.mubr.msk.f32.vlgmr.msra.gmra.mrb[8].mxu1 %vm85_vm1, %v246_v20  ;;  %503 = vperm.xlu1 %2370, %v2573_v19  }
  0x1c   :  { %332 = vmatprep.mubr.f32.mxu1 %v4417_v5  ;;  %2376 = vset.pattern.permute.xlu0 %v4427_v23 }
  0x1d   :  { %687 = vperm.xlu0 %2376, %v2521_v9  }
  0x1f   :  { %2276 = vmatmul.mubr.msk.f32.gmra.mrb[10].mxu1 %vm85_vm1, %v247_v21  ;;  %2371 = vset.pattern.permute.xlu1 %v4435_v13 }
  0x20   :  { %338 = vmatprep.mubr.f32.mxu1 %v4417_v5  ;;  %523 = vperm.xlu1 %2371, %v2550_v15  }
  0x21   :  { %695 = vperm.xlu0 %2376, %v2573_v19  }
  0x23   :  { %2277 = vmatmul.mubr.msk.f32.gmra.mrb[12].mxu1 %vm85_vm1, %v248_v22 }
  0x24   :  { %2372 = vset.pattern.permute.xlu1 %v4431_v24  ;;  %344 = vmatprep.mubr.f32.mxu1 %v4417_v5 }
  0x25   :  { %651 = vperm.xlu1 %2372, %v2527_v10   ;;  %2380 = vset.pattern.permute.xlu0 %v4429_v26 }
  0x26   :  { %715 = vperm.xlu0 %2380, %v2527_v10  }
  0x27   :  { %2278 = vmatmul.mubr.msk.f32.gmra.mrb[14].mxu1 %vm85_vm1, %v249_v25 }
  0x28   :  { %1095 = vmatprep.mubr.f32.mxu1 %v4417_v5 }
  0x29   :  { %655 = vperm.xlu1 %2372, %v2521_v9  }
  0x2a   :  { %723 = vperm.xlu0 %2380, %v2550_v15  }
  0x2d   :  { %2374 = vset.pattern.permute.xlu1 %v4433_v17 }
  0x2e   :  { %559 = vperm.xlu1 %2374, %v2573_v19   ;;  %2384 = vset.pattern.permute.xlu0 %v4425_v27 }
  0x2f   :  { %819 = vperm.xlu0 %2384, %v2550_v15  }
  0x32   :  { %2375 = vset.pattern.permute.xlu1 %v4427_v23 }
  0x33   :  { %683 = vperm.xlu1 %2375, %v2527_v10   ;;  %2385 = vset.pattern.permute.xlu0 %v4423_v28 }
  0x34   :  { %847 = vperm.xlu0 %2385, %v2521_v9  }
  0x37   :  { %2377 = vset.pattern.permute.xlu1 %v4431_v24 }
  0x38   :  { %659 = vperm.xlu1 %2377, %v2550_v15   ;;  %851 = vperm.xlu0 %2385, %v2550_v15  }
  0x3c   :  { %663 = vperm.xlu1 %2377, %v2573_v19   ;;  %2388 = vset.pattern.permute.xlu0 %v4421_v29 }
  0x3d   :  { %879 = vperm.xlu0 %2388, %v2521_v9  }
  0x40   :  { %2378 = vset.pattern.permute.xlu1 %v4429_v26 }
  0x41   :  { %719 = vperm.xlu1 %2378, %v2521_v9   ;;  %887 = vperm.xlu0 %2388, %v2573_v19  }
  0x45   :  { %2379 = vset.pattern.permute.xlu1 %v4427_v23  ;;  %2392 = vset.pattern.permute.xlu0 %v4419_v30  ;;  %v4540_v23 = vmov 0 }
  0x46   :  { %691 = vperm.xlu1 %2379, %v2550_v15  }
  0x4a   :  { %2381 = vset.pattern.permute.xlu1 %v4425_v27 }
  0x4b   :  { %811 = vperm.xlu1 %2381, %v2527_v10  }
  0x4f   :  { %815 = vperm.xlu1 %2381, %v2521_v9  }
  0x53   :  { %2382 = vset.pattern.permute.xlu1 %v4429_v26  ;;  %v4543_v26 = vmov 0 }
  0x54   :  { %727 = vperm.xlu1 %2382, %v2573_v19  }
  0x58   :  { %2383 = vset.pattern.permute.xlu1 %v4423_v28 }
  0x59   :  { %843 = vperm.xlu1 %2383, %v2527_v10  }
  0x5d   :  { %2386 = vset.pattern.permute.xlu1 %v4425_v27 }
  0x5e   :  { %823 = vperm.xlu1 %2386, %v2573_v19  }
  0x62   :  { %2387 = vset.pattern.permute.xlu1 %v4421_v29 }
  0x63   :  { %875 = vperm.xlu1 %2387, %v2527_v10  }
  0x67   :  { %2389 = vset.pattern.permute.xlu1 %v4423_v28 }
  0x68   :  { %855 = vperm.xlu1 %2389, %v2573_v19  }
  0x6c   :  { %2390 = vset.pattern.permute.xlu1 %v4421_v29 }
  0x6d   :  { %883 = vperm.xlu1 %2390, %v2550_v15  }
  0x71   :  { %2391 = vset.pattern.permute.xlu1 %v4419_v30 }
  0x72   :  { %908 = vperm.xlu1 %2391, %v2527_v10  }
  0x76   :  { %913 = vperm.xlu1 %2391, %v2521_v9  }
  0x83   :  { %v2721_v0 = vpop.permute.xlu0 %488 }
  0x85   :  { %v2651_v31 = vpop.permute.xlu1 %493 }
  0x88   :  { %v2735_v3 = vpop.permute.xlu0 %498 }
  0x8c   :  { %v2653_v32 = vpop.permute.xlu1 %515 }
  0x8e   :  { %v2745_v7 = vpop.permute.xlu0 %519 }
  0x91   :  { %v2655_v36 = vpop.permute.xlu1 %547 }
  0x92   :  { %v2755_v10 = vpop.permute.xlu0 %527 }
  0x93   :  { %4527 = vst [vmem:[#allocation15_spill] sm:$0xff] %v2755_v10 }
  0x95   :  { %v2657_v40 = vpop.permute.xlu1 %551 }
  0x97   :  { %v2761_v12 = vpop.permute.xlu0 %555 }
  0x98   :  { %4528 = vst [vmem:[#allocation16_spill] sm:$0xff] %v2761_v12 }
  0x9a   :  { %v2659_v44 = vpop.permute.xlu1 %503 }
  0x9b   :  { %4517 = vst [vmem:[#allocation5_spill] sm:$0xff] %v2659_v44 }
  0x9c   :  { %v2765_v16 = vpop.permute.xlu0 %687 }
  0x9f   :  { %v2669_v50 = vpop.permute.xlu1 %523 }
  0xa0   :  { %4518 = vst [vmem:[#allocation6_spill] sm:$0xff] %v2669_v50  ;;  %v2769_v20 = vpop.permute.xlu0 %695 }
  0xa1   :  { %4530 = vst [vmem:[#allocation18_spill] sm:$0xff] %v2769_v20 }
  0xa4   :  { %v2681_v55 = vpop.permute.xlu1 %651 }
  0xa5   :  { %v2773_v22 = vpop.permute.xlu0 %715 }
  0xa8   :  { %v2687_v57 = vpop.permute.xlu1 %655 }
  0xad   :  { %v2699_v59 = vpop.permute.xlu1 %559 }
  0xae   :  { %4519 = vst [vmem:[#allocation7_spill] sm:$0xff] %v2699_v59 }
  0xb2   :  { %v2707_v61 = vpop.permute.xlu1 %683 }
  0xb7   :  { %v2719_v63 = vpop.permute.xlu1 %659 }
  0xb8   :  { %4522 = vst [vmem:[#allocation10_spill] sm:$0xff] %v2719_v63 }
  0xbb   :  { %v2729_v2 = vpop.permute.xlu1 %663 }
  0xbc   :  { %4524 = vst [vmem:[#allocation12_spill] sm:$0xff] %v2729_v2 }
  0xc0   :  { %v2743_v6 = vpop.permute.xlu1 %719 }
  0xc5   :  { %v2751_v9 = vpop.permute.xlu1 %691 }
  0xc6   :  { %4526 = vst [vmem:[#allocation14_spill] sm:$0xff] %v2751_v9 }
  0xca   :  { %v2759_v11 = vpop.permute.xlu1 %811 }
  0xce   :  { %v2763_v14 = vpop.permute.xlu1 %815 }
  0xd3   :  { %v2767_v18 = vpop.permute.xlu1 %727 }
  0xd4   :  { %4529 = vst [vmem:[#allocation17_spill] sm:$0xff] %v2767_v18 }
  0xd8   :  { %v2771_v21 = vpop.permute.xlu1 %843 }
  0xdd   :  { %v2775_v25 = vpop.permute.xlu1 %823 }
  0xde   :  { %v207_v33 = vpop.f32.mrb[0].mxu1  ;;  %4531 = vst [vmem:[#allocation19_spill] sm:$0xff] %v2775_v25 }
  0xdf   :  { %238 = vst [vmem:[#allocation2 + $0x80] sm:$0xff] %v207_v33  ;;  %v209_v34 = vpop.f32.mrb[1].mxu1  ;;  %v2777_v33 = vpop.permute.xlu0 %723 }
  0xe0   :  { %239 = vst [vmem:[#allocation2 + $0x88] sm:$0xff] %v209_v34  ;;  %4532 = vst [vmem:[#allocation20_spill] sm:$0xff] %v2777_v33 }
  0xe2   :  { %v213_v35 = vpop.f32.mrb[2].mxu1  ;;  %v2779_v34 = vpop.permute.xlu1 %875 }
  0xe3   :  { %240 = vst [vmem:[#allocation2 + $0xa0] sm:$0xff] %v213_v35  ;;  %v215_v37 = vpop.f32.mrb[3].mxu1  ;;  %v2781_v35 = vpop.permute.xlu0 %819 }
  0xe4   :  { %241 = vst [vmem:[#allocation2 + $0xa8] sm:$0xff] %v215_v37  ;;  %4533 = vst [vmem:[#allocation21_spill] sm:$0xff] %v2781_v35 }
  0xe6   :  { %v219_v38 = vpop.f32.mrb[4].mxu1 }
  0xe7   :  { %242 = vst [vmem:[#allocation2 + $0xc0] sm:$0xff] %v219_v38  ;;  %v221_v39 = vpop.f32.mrb[5].mxu1  ;;  %v2783_v37 = vpop.permute.xlu1 %855 }
  0xe8   :  { %243 = vst [vmem:[#allocation2 + $0xc8] sm:$0xff] %v221_v39  ;;  %4534 = vst [vmem:[#allocation22_spill] sm:$0xff] %v2783_v37  ;;  %v2785_v38 = vpop.permute.xlu0 %847  ;;  %v4546_v37 = vmov 0 }
  0xea   :  { %v225_v41 = vpop.f32.mrb[6].mxu1 }
  0xeb   :  { %244 = vst [vmem:[#allocation2 + $0xe0] sm:$0xff] %v225_v41  ;;  %v227_v42 = vpop.f32.mrb[7].mxu1 }
  0xec   :  { %245 = vst [vmem:[#allocation2 + $0xe8] sm:$0xff] %v227_v42  ;;  %v2787_v39 = vpop.permute.xlu1 %883  ;;  %v2789_v41 = vpop.permute.xlu0 %851 }
  0xed   :  { %4535 = vst [vmem:[#allocation23_spill] sm:$0xff] %v2787_v39  ;;  %4536 = vst [vmem:[#allocation24_spill] sm:$0xff] %v2789_v41  ;;  %v4549_v41 = vmov 0 }
  0xee   :  { %v328_v43 = vpop.f32.mrb[8].mxu1 }
  0xef   :  { %v2661_v45 = vmax.f32 %v328_v43, 0.0  ;;  %v330_v46 = vpop.f32.mrb[9].mxu1 }
  0xf0   :  { %v2667_v48 = vmax.f32 %v330_v46, 0.0  ;;  %v2793_v43 = vpop.permute.xlu0 %879 }
  0xf1   :  { %359 = vrot.lane.b32.xlu0 %v2661_v45, %s2457_s9  ;;  %746 = vrot.lane.b32.xlu1 %v2661_v45, %s2458_s10  ;;  %v2791_v42 = vpop.permute.xlu1 %908 }
  0xf2   :  { %v334_v47 = vpop.f32.mrb[10].mxu1  ;;  %4537 = vst [vmem:[#allocation25_spill] sm:$0xff] %v2791_v42 }
  0xf3   :  { %v336_v49 = vpop.f32.mrb[11].mxu1  ;;  %v2675_v51 = vmax.f32 %v334_v47, 0.0 }
  0xf4   :  { %v2693_v58 = vmax.f32 %v336_v49, 0.0  ;;  %v2797_v47 = vpop.permute.xlu0 %887 }
  0xf5   :  { %384 = vrot.lane.b32.xlu0 %v2661_v45, %s2459_s11  ;;  %367 = vrot.lane.b32.xlu1 %v2667_v48, %s2457_s9  ;;  %v2795_v46 = vpop.permute.xlu1 %913  ;;  %4539 = vst [vmem:[#allocation27_spill] sm:$0xff] %v2797_v47 }
  0xf6   :  { %v340_v52 = vpop.f32.mrb[12].mxu1  ;;  %4538 = vst [vmem:[#allocation26_spill] sm:$0xff] %v2795_v46 }
  0xf7   :  { %v342_v53 = vpop.f32.mrb[13].mxu1  ;;  %v2703_v60 = vmax.f32 %v340_v52, 0.0 }
  0xf8   :  { %v2727_v1 = vmax.f32 %v342_v53, 0.0  ;;  %v24_v53 = vlaneseq }
  0xf9   :  { %770 = vrot.lane.b32.xlu0 %v2661_v45, %s2460_s12  ;;  %386 = vrot.lane.b32.xlu1 %v2675_v51, %s2459_s11  ;;  %4520 = vst [vmem:[#allocation8_spill] sm:$0xff] %v2703_v60 }
  0xfa   :  { %v346_v54 = vpop.f32.mrb[14].mxu1  ;;  %4523 = vst [vmem:[#allocation11_spill] sm:$0xff] %v2727_v1  ;;  %v2801_v5 = vand.u32 127, %v24_v53 }
  0xfb   :  { %v348_v56 = vpop.f32.mrb[15].mxu1  ;;  %v2717_v62 = vmax.f32 %v346_v54, 0.0 }
  0xfc   :  { %v2741_v4 = vmax.f32 %v348_v56, 0.0  ;;  %v31_v30 = vand.u32 15, %v2801_v5  ;;  %v2805_v29 = vadd.s32 128, %v2801_v5  ;;  %vm375_vm2 = vcmp.lt.s32.totalorder %v2801_v5, 1 }
  0xfd   :  { %392 = vrot.lane.b32.xlu0 %v2667_v48, %s2459_s11  ;;  %748 = vrot.lane.b32.xlu1 %v2675_v51, %s2458_s10  ;;  %4521 = vst [vmem:[#allocation9_spill] sm:$0xff] %v2717_v62  ;;  %vm400_vm3 = vcmp.lt.s32.totalorder %v2801_v5, 127  ;;  %vm55_vm8 = vcmp.lt.s32.totalorder %v2801_v5, 16  ;;  %vm457_vm9 = vcmp.lt.s32.totalorder %v2801_v5, 112 }
  0xfe   :  { %4525 = vst [vmem:[#allocation13_spill] sm:$0xff] %v2741_v4  ;;  %vm2811_vm4 = vcmp.eq.s32.totalorder %v31_v30, 15  ;;  %vm2815_vm5 = vcmp.eq.s32.totalorder %v31_v30, 0  ;;  %v38_v53 = vand.u32 15, %v2805_v29  ;;  %vm58_vm10 = vcmp.ge.s32.totalorder %v2805_v29, 240 }
  0xff   :  { %v4541_v23 = vsel %vm2811_vm4, 4294967295, %v4540_v23  ;;  %v4544_v26 = vsel %vm2815_vm5, 4294967295, %v4543_v26 }
 0x100   :  { %4542 = vst [vmem:[#allocation28_spill] sm:$0xff] %v4541_v23  ;;  %4545 = vst [vmem:[#allocation29_spill] sm:$0xff] %v4544_v26  ;;  %vm2840_vm6 = vcmp.eq.s32.totalorder %v38_v53, 15  ;;  %vm2844_vm7 = vcmp.eq.s32.totalorder %v38_v53, 0 }
 0x101   :  { %754 = vrot.lane.b32.xlu0 %v2667_v48, %s2458_s10  ;;  %772 = vrot.lane.b32.xlu1 %v2675_v51, %s2460_s12  ;;  %v4547_v37 = vsel %vm2840_vm6, 4294967295, %v4546_v37  ;;  %v4550_v41 = vsel %vm2844_vm7, 4294967295, %v4549_v41 }
 0x102   :  { %4548 = vst [vmem:[#allocation30_spill] sm:$0xff] %v4547_v37  ;;  %4551 = vst [vmem:[#allocation31_spill] sm:$0xff] %v4550_v41 }
 0x105   :  { %778 = vrot.lane.b32.xlu0 %v2667_v48, %s2460_s12  ;;  %369 = vrot.lane.b32.xlu1 %v2693_v58, %s2457_s9 }
 0x109   :  { %361 = vrot.lane.b32.xlu0 %v2675_v51, %s2457_s9  ;;  %394 = vrot.lane.b32.xlu1 %v2693_v58, %s2459_s11 }
 0x10d   :  { %363 = vrot.lane.b32.xlu0 %v2703_v60, %s2457_s9  ;;  %756 = vrot.lane.b32.xlu1 %v2693_v58, %s2458_s10 }
 0x111   :  { %388 = vrot.lane.b32.xlu0 %v2703_v60, %s2459_s11  ;;  %780 = vrot.lane.b32.xlu1 %v2693_v58, %s2460_s12 }
 0x115   :  { %750 = vrot.lane.b32.xlu0 %v2703_v60, %s2458_s10  ;;  %365 = vrot.lane.b32.xlu1 %v2717_v62, %s2457_s9 }
 0x119   :  { %371 = vrot.lane.b32.xlu0 %v2727_v1, %s2457_s9  ;;  %390 = vrot.lane.b32.xlu1 %v2717_v62, %s2459_s11 }
 0x11d   :  { %396 = vrot.lane.b32.xlu0 %v2727_v1, %s2459_s11  ;;  %752 = vrot.lane.b32.xlu1 %v2717_v62, %s2458_s10 }
 0x121   :  { %758 = vrot.lane.b32.xlu0 %v2727_v1, %s2458_s10  ;;  %373 = vrot.lane.b32.xlu1 %v2741_v4, %s2457_s9 }
 0x125   :  { %398 = vrot.lane.b32.xlu1 %v2741_v4, %s2459_s11 }
 0x129   :  { %760 = vrot.lane.b32.xlu1 %v2741_v4, %s2458_s10 }
 0x163   :  { %v360_v49 = vpop.permute.xlu0 %359  ;;  %v2799_v52 = vpop.permute.xlu1 %746 }
 0x167   :  { %v385_v54 = vpop.permute.xlu0 %384  ;;  %v368_v56 = vpop.permute.xlu1 %367 }
 0x168   :  { %v380_v13 = vsel %vm375_vm2, %v368_v56, %v360_v49 }
 0x16b   :  { %v2807_v28 = vpop.permute.xlu0 %770  ;;  %v387_v27 = vpop.permute.xlu1 %386 }
 0x16f   :  { %v393_v24 = vpop.permute.xlu0 %392  ;;  %v2820_v17 = vpop.permute.xlu1 %748 }
 0x170   :  { %v401_v8 = vsel %vm400_vm3, %v385_v54, %v393_v24  ;;  %v405_v39 = vsel %vm400_vm3, %v393_v24, %v385_v54 }
 0x171   :  { %v2828_v47 = vsel %vm2811_vm4, %v380_v13, %v401_v8  ;;  %v2832_v30 = vsel %vm2815_vm5, %v401_v8, %v380_v13  ;;  %v376_v13 = vsel %vm375_vm2, %v360_v49, %v368_v56 }
 0x172   :  { %586 = vrot.lane.b32.xlu1 %v2828_v47, %s2458_s10  ;;  %417 = vrot.lane.b32.xlu0 %v2832_v30, %s2458_s10  ;;  %v2856_v24 = vsel %vm2840_vm6, %v376_v13, %v405_v39  ;;  %v2860_v54 = vsel %vm2844_vm7, %v405_v39, %v376_v13 }
 0x173   :  { %v2848_v25 = vpop.permute.xlu0 %754  ;;  %v2850_v8 = vpop.permute.xlu1 %772 }
 0x176   :  { %594 = vrot.lane.b32.xlu1 %v2856_v24, %s2458_s10  ;;  %425 = vrot.lane.b32.xlu0 %v2860_v54, %s2458_s10 }
 0x177   :  { %v2866_v53 = vpop.permute.xlu0 %778  ;;  %v370_v35 = vpop.permute.xlu1 %369 }
 0x17a   :  { %610 = vrot.lane.b32.xlu1 %v2828_v47, %s2460_s12  ;;  %441 = vrot.lane.b32.xlu0 %v2832_v30, %s2460_s12 }
 0x17b   :  { %v362_v49 = vpop.permute.xlu0 %361  ;;  %v395_v56 = vpop.permute.xlu1 %394 }
 0x17c   :  { %v381_v39 = vsel %vm375_vm2, %v370_v35, %v362_v49  ;;  %v402_v13 = vsel %vm400_vm3, %v387_v27, %v395_v56  ;;  %v377_v59 = vsel %vm375_vm2, %v362_v49, %v370_v35  ;;  %v406_v10 = vsel %vm400_vm3, %v395_v56, %v387_v27 }
 0x17d   :  { %v2884_v20 = vsel %vm2815_vm5, %v402_v13, %v381_v39  ;;  %v2888_v2 = vsel %vm2811_vm4, %v381_v39, %v402_v13  ;;  %v2902_v63 = vsel %vm2844_vm7, %v406_v10, %v377_v59  ;;  %v2906_v39 = vsel %vm2840_vm6, %v377_v59, %v406_v10 }
 0x17e   :  { %618 = vrot.lane.b32.xlu1 %v2856_v24, %s2460_s12  ;;  %449 = vrot.lane.b32.xlu0 %v2860_v54, %s2460_s12 }
 0x17f   :  { %v364_v33 = vpop.permute.xlu0 %363  ;;  %v2880_v18 = vpop.permute.xlu1 %756 }
 0x182   :  { %419 = vrot.lane.b32.xlu1 %v2884_v20, %s2458_s10  ;;  %588 = vrot.lane.b32.xlu0 %v2888_v2, %s2458_s10 }
 0x183   :  { %v389_v44 = vpop.permute.xlu0 %388  ;;  %v2898_v9 = vpop.permute.xlu1 %780 }
 0x186   :  { %427 = vrot.lane.b32.xlu1 %v2902_v63, %s2458_s10  ;;  %596 = vrot.lane.b32.xlu0 %v2906_v39, %s2458_s10 }
 0x187   :  { %v2912_v27 = vpop.permute.xlu0 %750  ;;  %v366_v35 = vpop.permute.xlu1 %365 }
 0x188   :  { %4552 = vst [vmem:[#allocation32_spill] sm:$0xff] %v2912_v27 }
 0x18a   :  { %443 = vrot.lane.b32.xlu1 %v2884_v20, %s2460_s12  ;;  %612 = vrot.lane.b32.xlu0 %v2888_v2, %s2460_s12 }
 0x18b   :  { %v372_v49 = vpop.permute.xlu0 %371  ;;  %v391_v56 = vpop.permute.xlu1 %390 }
 0x18c   :  { %v378_v13 = vsel %vm375_vm2, %v364_v33, %v372_v49  ;;  %v382_v27 = vsel %vm375_vm2, %v372_v49, %v364_v33 }
 0x18e   :  { %451 = vrot.lane.b32.xlu1 %v2902_v63, %s2460_s12  ;;  %620 = vrot.lane.b32.xlu0 %v2906_v39, %s2460_s12 }
 0x18f   :  { %v397_v59 = vpop.permute.xlu0 %396  ;;  %v2922_v10 = vpop.permute.xlu1 %752 }
 0x190   :  { %4553 = vst [vmem:[#allocation33_spill] sm:$0xff] %v2922_v10  ;;  %v403_v46 = vsel %vm400_vm3, %v389_v44, %v397_v59  ;;  %v407_v42 = vsel %vm400_vm3, %v397_v59, %v389_v44 }
 0x191   :  { %v2934_v12 = vsel %vm2815_vm5, %v403_v46, %v382_v27  ;;  %v2938_v50 = vsel %vm2840_vm6, %v378_v13, %v407_v42  ;;  %v2946_v49 = vsel %vm2844_vm7, %v407_v42, %v378_v13  ;;  %v2950_v44 = vsel %vm2811_vm4, %v382_v27, %v403_v46 }
 0x192   :  { %4554 = vst [vmem:[#allocation34_spill] sm:$0xff] %v2934_v12  ;;  %4555 = vst [vmem:[#allocation35_spill] sm:$0xff] %v2938_v50  ;;  %421 = vrot.lane.b32.xlu1 %v2934_v12, %s2458_s10  ;;  %598 = vrot.lane.b32.xlu0 %v2938_v50, %s2458_s10 }
 0x193   :  { %v374_v33 = vpop.permute.xlu1 %373  ;;  %4556 = vst [vmem:[#allocation36_spill] sm:$0xff] %v2946_v49  ;;  %4557 = vst [vmem:[#allocation37_spill] sm:$0xff] %v2950_v44 }
 0x194   :  { %v383_v42 = vsel %vm375_vm2, %v374_v33, %v366_v35  ;;  %v379_v13 = vsel %vm375_vm2, %v366_v35, %v374_v33  ;;  %v1193_v33 = vld [vmem:[%s4410_s0 + $0x18] sm:$0xff] }
 0x196   :  { %429 = vrot.lane.b32.xlu1 %v2946_v49, %s2458_s10  ;;  %614 = vrot.lane.b32.xlu0 %v2950_v44, %s2460_s12 }
 0x197   :  { %v399_v59 = vpop.permute.xlu1 %398 }
 0x198   :  { %v404_v10 = vsel %vm400_vm3, %v391_v56, %v399_v59  ;;  %v408_v27 = vsel %vm400_vm3, %v399_v59, %v391_v56  ;;  %v1195_v59 = vld [vmem:[%s4410_s0 + $0x38] sm:$0xff] }
 0x199   :  { %v2966_v46 = vsel %vm2815_vm5, %v404_v10, %v383_v42  ;;  %v2990_v56 = vsel %vm2811_vm4, %v383_v42, %v404_v10  ;;  %v2998_v35 = vsel %vm2840_vm6, %v379_v13, %v408_v27  ;;  %v4562_v10 = vmov 1  }
 0x19a   :  { %445 = vrot.lane.b32.xlu1 %v2934_v12, %s2460_s12  ;;  %622 = vrot.lane.b32.xlu0 %v2938_v50, %s2460_s12  ;;  %4558 = vst [vmem:[#allocation38_spill] sm:$0xff] %v2966_v46  ;;  %v2978_v50 = vsel %vm2844_vm7, %v408_v27, %v379_v13  ;;  %4560 = vst [vmem:[#allocation40_spill] sm:$0xff] %v2990_v56  ;;  %v3022_v42 = vpack.c.bf16 %v1195_v59, %v1193_v33 }
 0x19b   :  { %4559 = vst [vmem:[#allocation39_spill] sm:$0xff] %v2978_v50  ;;  %4561 = vst [vmem:[#allocation41_spill] sm:$0xff] %v2998_v35  ;;  %v3027_v27 = vpop.permute.xlu1 %760 }
 0x19c   :  { %4563 = vst [vmem:[#allocation42_spill] sm:$0xff] %v3022_v42  ;;  %2328 = vmatprep.subr.bf16.mxu0 %v3022_v42  ;;  %4565 = vst [vmem:[#allocation44_spill] sm:$0xff] %v3027_v27 }
 0x19e   :  { %453 = vrot.lane.b32.xlu1 %v2946_v49, %s2460_s12  ;;  %423 = vrot.lane.b32.xlu0 %v2966_v46, %s2458_s10 }
 0x1a2   :  { %590 = vrot.lane.b32.xlu1 %v2950_v44, %s2458_s10  ;;  %431 = vrot.lane.b32.xlu0 %v2978_v50, %s2458_s10 }
 0x1a6   :  { %776 = vrot.lane.b32.xlu1 %v2717_v62, %s2460_s12  ;;  %447 = vrot.lane.b32.xlu0 %v2966_v46, %s2460_s12  ;;  %v530_v46 = vmul.f32 %v2653_v32, %v2832_v30 }
 0x1aa   :  { %592 = vrot.lane.b32.xlu1 %v2990_v56, %s2458_s10  ;;  %455 = vrot.lane.b32.xlu0 %v2978_v50, %s2460_s12 }
 0x1ae   :  { %600 = vrot.lane.b32.xlu1 %v2998_v35, %s2458_s10  ;;  %774 = vrot.lane.b32.xlu0 %v2703_v60, %s2460_s12 }
 0x1b2   :  { %616 = vrot.lane.b32.xlu1 %v2990_v56, %s2460_s12  ;;  %782 = vrot.lane.b32.xlu0 %v2727_v1, %s2460_s12 }
 0x1b6   :  { %624 = vrot.lane.b32.xlu1 %v2998_v35, %s2460_s12  ;;  %918 = vperm.xlu0 %2392, %v2550_v15   ;;  %v3025_v15 = vpop.permute.xlu0 %758  ;;  %v531_v35 = vmul.f32 %v2653_v32, %v2860_v54 }
 0x1b7   :  { %4564 = vst [vmem:[#allocation43_spill] sm:$0xff] %v3025_v15  ;;  %v4566_v15 = vmov 4  }
 0x1ba   :  { %784 = vrot.lane.b32.xlu1 %v2741_v4, %s2460_s12  ;;  %2394 = vset.pattern.permute.xlu0 %v4562_v10  ;;  %v3033_v4 = vld [vmem:[%s4414_s4] sm:$0xff] }
 0x1be   :  { %923 = vperm.xlu1 %2391, %v2573_v19  }
 0x1c2   :  { %2393 = vset.pattern.permute.xlu1 %v4562_v10 }
 0x1c3   :  { %1604 = vperm.xlu1 %2393, %v3033_v4  }
 0x1c7   :  { %2395 = vset.pattern.permute.xlu1 %v4566_v15 }
 0x1c8   :  { %1631 = vperm.xlu1 %2395, %v3033_v4  }
 0x1e4   :  { %v587_v13 = vpop.permute.xlu1 %586  ;;  %v418_v19 = vpop.permute.xlu0 %417 }
 0x1e8   :  { %v595_v37 = vpop.permute.xlu1 %594  ;;  %v426_v41 = vpop.permute.xlu0 %425 }
 0x1e9   :  { %v433_v33 = vsel %vm55_vm8, %v418_v19, %v426_v41  ;;  %v437_v1 = vsel %vm55_vm8, %v426_v41, %v418_v19  ;;  %v3060_v19 = vld [vmem:[%s4414_s4 + $0x8] sm:$0xff] }
 0x1ea   :  { %v507_v59 = vmul.f32 %v2721_v0, %v433_v33  ;;  %1609 = vperm.xlu0 %2394, %v3060_v19   ;;  %1635 = vperm.xlu1 %2395, %v3060_v19  }
 0x1ec   :  { %v611_v23 = vpop.permute.xlu1 %610  ;;  %v442_v26 = vpop.permute.xlu0 %441 }
 0x1f0   :  { %v619_v42 = vpop.permute.xlu1 %618  ;;  %v450_v62 = vpop.permute.xlu0 %449 }
 0x1f1   :  { %v626_v60 = vsel %vm457_vm9, %v611_v23, %v619_v42  ;;  %v458_v27 = vsel %vm457_vm9, %v442_v26, %v450_v62  ;;  %v462_v56 = vsel %vm457_vm9, %v450_v62, %v442_v26  ;;  %v602_v26 = vsel %vm55_vm8, %v587_v13, %v595_v37 }
 0x1f2   :  { %v466_v41 = vsel %vm55_vm8, %v458_v27, %v437_v1  ;;  %v606_v62 = vsel %vm55_vm8, %v595_v37, %v587_v13  ;;  %v475_v30 = vsel %vm58_vm10, %v433_v33, %v462_v56  ;;  %v539_v1 = vadd.f32 %v531_v35, %v507_v59  ;;  %v3078_v37 = vld [vmem:[%s4414_s4 + $0x18] sm:$0xff] }
 0x1f3   :  { %v506_v32 = vmul.f32 %v2721_v0, %v466_v41  ;;  %v630_v54 = vsel %vm457_vm9, %v619_v42, %v611_v23  ;;  %v634_v50 = vsel %vm55_vm8, %v626_v60, %v606_v62  ;;  %v563_v44 = vmul.f32 %v2655_v36, %v475_v30  ;;  %1619 = vperm.xlu0 %2394, %v3078_v37  }
 0x1f4   :  { %v420_v12 = vpop.permute.xlu1 %419  ;;  %v589_v49 = vpop.permute.xlu0 %588  ;;  %v562_v0 = vmul.f32 %v2655_v36, %v458_v27  ;;  %v667_v35 = vmul.f32 %v2681_v55, %v602_v26  ;;  %v643_v23 = vsel %vm58_vm10, %v602_v26, %v630_v54  ;;  %v666_v42 = vmul.f32 %v2681_v55, %v634_v50 }
 0x1f5   :  { %v538_v56 = vadd.f32 %v530_v46, %v506_v32  ;;  %v571_v13 = vadd.f32 %v563_v44, %v539_v1  ;;  %v699_v59 = vmul.f32 %v2707_v61, %v2856_v24  ;;  %v3093_v36 = vsel %vm457_vm9, %v2807_v28, %v2866_v53 }
 0x1f6   :  { %v698_v41 = vmul.f32 %v2707_v61, %v2828_v47  ;;  %v3101_v50 = vsel %vm55_vm8, %v2799_v52, %v2848_v25  ;;  %v766_v24 = vsel %vm55_vm8, %v2848_v25, %v2799_v52  ;;  %v731_v26 = vmul.f32 %v2773_v22, %v643_v23 }
 0x1f7   :  { %v570_v33 = vadd.f32 %v562_v0, %v538_v56  ;;  %v675_v44 = vadd.f32 %v667_v35, %v571_v13  ;;  %v4567_v30 = vmov 7   ;;  %v794_v61 = vsel %vm55_vm8, %v3093_v36, %v766_v24 }
 0x1f8   :  { %v428_v46 = vpop.permute.xlu1 %427  ;;  %v597_v27 = vpop.permute.xlu0 %596  ;;  %2396 = vset.pattern.permute.xlu1 %v4567_v30  ;;  %v730_v47 = vmul.f32 %v2773_v22, %v626_v60  ;;  %2398 = vset.pattern.permute.xlu0 %v4567_v30  ;;  %v827_v1 = vmul.f32 %v2759_v11, %v3101_v50  ;;  %v3123_v60 = vld [vmem:[%s4414_s4 + $0x10] sm:$0xff]  ;;  %v859_v22 = vmul.f32 %v2771_v21, %v2667_v48 }
 0x1f9   :  { %v674_v55 = vadd.f32 %v666_v42, %v570_v33  ;;  %v707_v62 = vadd.f32 %v699_v59, %v675_v44  ;;  %1667 = vperm.xlu1 %2396, %v3060_v19   ;;  %v434_v25 = vsel %vm55_vm8, %v420_v12, %v428_v46  ;;  %1663 = vperm.xlu0 %2398, %v3033_v4  }
 0x1fa   :  { %v826_v35 = vmul.f32 %v2759_v11, %v794_v61  ;;  %v858_v23 = vmul.f32 %v2771_v21, %v2661_v45  ;;  %v533_v42 = vmul.f32 %v2745_v7, %v2902_v63  ;;  %v509_v33 = vmul.f32 %v2651_v31, %v434_v25 }
 0x1fb   :  { %v706_v32 = vadd.f32 %v698_v41, %v674_v55  ;;  %v739_v56 = vadd.f32 %v731_v26, %v707_v62  ;;  %v438_v44 = vsel %vm55_vm8, %v428_v46, %v420_v12  ;;  %v603_v45 = vsel %vm55_vm8, %v589_v49, %v597_v27 }
 0x1fc   :  { %v444_v52 = vpop.permute.xlu1 %443  ;;  %v613_v54 = vpop.permute.xlu0 %612  ;;  %v532_v21 = vmul.f32 %v2745_v7, %v2884_v20  ;;  %v541_v26 = vadd.f32 %v533_v42, %v509_v33  ;;  %v767_v42 = vsel %vm55_vm8, %v2880_v18, %v2820_v17 }
 0x1fd   :  { %v738_v0 = vadd.f32 %v730_v47, %v706_v32  ;;  %v835_v13 = vadd.f32 %v827_v1, %v739_v56  ;;  %2397 = vset.pattern.permute.xlu1 %v4562_v10  ;;  %1675 = vperm.xlu0 %2398, %v3078_v37   ;;  %v607_v10 = vsel %vm55_vm8, %v597_v27, %v589_v49 }
 0x1fe   :  { %1614 = vperm.xlu1 %2397, %v3123_v60   ;;  %v669_v32 = vmul.f32 %v2687_v57, %v603_v45  ;;  %v763_v56 = vsel %vm55_vm8, %v2820_v17, %v2880_v18 }
 0x1ff   :  { %v834_v59 = vadd.f32 %v826_v35, %v738_v0  ;;  %v3136_v48 = vadd.f32 %v859_v22, %v835_v13  ;;  %v787_v0 = vsel %vm457_vm9, %v2850_v8, %v2898_v9  ;;  %v700_v35 = vmul.f32 %v2765_v16, %v2888_v2 }
 0x200   :  { %v452_v41 = vpop.permute.xlu1 %451  ;;  %v621_v55 = vpop.permute.xlu0 %620 }
 0x201   :  { %v459_v63 = vsel %vm457_vm9, %v444_v52, %v452_v41  ;;  %v463_v11 = vsel %vm457_vm9, %v452_v41, %v444_v52  ;;  %v627_v12 = vsel %vm457_vm9, %v613_v54, %v621_v55  ;;  %v631_v47 = vsel %vm457_vm9, %v621_v55, %v613_v54 }
 0x202   :  { %v468_v46 = vsel %vm55_vm8, %v459_v63, %v438_v44  ;;  %v477_v24 = vsel %vm58_vm10, %v434_v25, %v463_v11  ;;  %v636_v7 = vsel %vm55_vm8, %v627_v12, %v607_v10  ;;  %v3165_v27 = vadd.f32 %v858_v23, %v834_v59  ;;  %2399 = vset.pattern.permute.xlu1 %v4566_v15 }
 0x203   :  { %v508_v62 = vmul.f32 %v2651_v31, %v468_v46  ;;  %v565_v61 = vmul.f32 %v2657_v40, %v477_v24  ;;  %v564_v31 = vmul.f32 %v2657_v40, %v459_v63  ;;  %1639 = vperm.xlu1 %2399, %v3123_v60   ;;  %v4568_v52 = vmov 3  }
 0x204   :  { %v422_v20 = vpop.permute.xlu1 %421  ;;  %v3163_v49 = vpop.permute.xlu0 %598  ;;  %2402 = vset.pattern.permute.xlu0 %v4568_v52  ;;  %v790_v54 = vsel %vm457_vm9, %v2866_v53, %v2807_v28  ;;  %v701_v15 = vmul.f32 %v2765_v16, %v2906_v39  ;;  %v645_v40 = vsel %vm58_vm10, %v603_v45, %v631_v47  ;;  %v668_v53 = vmul.f32 %v2687_v57, %v636_v7 }
 0x205   :  { %v540_v1 = vadd.f32 %v532_v21, %v508_v62  ;;  %v573_v25 = vadd.f32 %v565_v61, %v541_v26  ;;  %1767 = vperm.xlu0 %2402, %v3033_v4   ;;  %v791_v39 = vsel %vm457_vm9, %v2898_v9, %v2850_v8  ;;  %v733_v57 = vmul.f32 %v2743_v6, %v645_v40 }
 0x206   :  { %v803_v2 = vsel %vm58_vm10, %v3101_v50, %v790_v54  ;;  %v829_v9 = vmul.f32 %v2763_v14, %v763_v56  ;;  %v796_v16 = vsel %vm55_vm8, %v787_v0, %v767_v42  ;;  %v805_v17 = vsel %vm58_vm10, %v763_v56, %v791_v39 }
 0x207   :  { %v572_v22 = vadd.f32 %v564_v31, %v540_v1  ;;  %v677_v28 = vadd.f32 %v669_v32, %v573_v25  ;;  %1643 = vperm.xlu1 %2399, %v3078_v37   ;;  %v732_v8 = vmul.f32 %v2743_v6, %v627_v12  ;;  %v861_v41 = vmul.f32 %v2785_v38, %v2693_v58 }
 0x208   :  { %v430_v13 = vpop.permute.xlu1 %429  ;;  %v3195_v23 = vpop.permute.xlu0 %614  ;;  %v891_v63 = vmul.f32 %v2779_v34, %v803_v2  ;;  %v828_v11 = vmul.f32 %v2763_v14, %v796_v16  ;;  %v860_v6 = vmul.f32 %v2785_v38, %v2675_v51  ;;  %v893_v12 = vmul.f32 %v2793_v43, %v805_v17  ;;  %v4570_v51 = vld [vmem:[#allocation36_spill] sm:$0xff]  ;;  %v4571_v38 = vld [vmem:[#allocation6_spill] sm:$0xff] }
 0x209   :  { %v709_v33 = vadd.f32 %v701_v15, %v677_v28  ;;  %v676_v59 = vadd.f32 %v668_v53, %v572_v22  ;;  %1775 = vperm.xlu0 %2402, %v3123_v60   ;;  %v435_v50 = vsel %vm55_vm8, %v422_v20, %v430_v13  ;;  %v4569_v58 = vmov 9   ;;  %v4574_v28 = vld [vmem:[#allocation25_spill] sm:$0xff]  ;;  %v4577_v17 = vld [vmem:[#allocation10_spill] sm:$0xff] }
 0x20a   :  { %v511_v24 = vmul.f32 %v2735_v3, %v435_v50  ;;  %v899_v62 = vadd.f32 %v891_v63, %v3136_v48  ;;  %v890_v14 = vmul.f32 %v2779_v34, %v3093_v36  ;;  %v892_v61 = vmul.f32 %v2793_v43, %v787_v0  ;;  %v4572_v34 = vld [vmem:[#allocation34_spill] sm:$0xff]  ;;  %v4573_v0 = vld [vmem:[#allocation16_spill] sm:$0xff] }
 0x20b   :  { %v708_v18 = vadd.f32 %v700_v35, %v676_v59  ;;  %v741_v44 = vadd.f32 %v733_v57, %v709_v33  ;;  %2400 = vset.pattern.permute.xlu1 %v4568_v52  ;;  %v535_v47 = vmul.f32 %v4571_v38, %v4570_v51  ;;  %v439_v32 = vsel %vm55_vm8, %v430_v13, %v422_v20 }
 0x20c   :  { %v446_v55 = vpop.permute.xlu1 %445  ;;  %v3217_v45 = vpop.permute.xlu0 %622  ;;  %1771 = vperm.xlu1 %2400, %v3060_v19   ;;  %v534_v43 = vmul.f32 %v4571_v38, %v4572_v34  ;;  %v898_v56 = vadd.f32 %v890_v14, %v3165_v27  ;;  %v927_v53 = vadd.f32 %v4574_v28, %v899_v62  ;;  %v4581_v14 = vmov 2   ;;  %v4583_v34 = vld [vmem:[#allocation39_spill] sm:$0xff] }
 0x20d   :  { %v740_v21 = vadd.f32 %v732_v8, %v708_v18  ;;  %v837_v10 = vadd.f32 %v829_v9, %v741_v44  ;;  %2406 = vset.pattern.permute.xlu0 %v4569_v58  ;;  %v543_v15 = vadd.f32 %v535_v47, %v511_v24  ;;  %v3259_v35 = vsel %vm457_vm9, %v3195_v23, %v3217_v45  ;;  %v4578_v44 = vld [vmem:[#allocation35_spill] sm:$0xff]  ;;  %v4580_v24 = vld [vmem:[#allocation37_spill] sm:$0xff] }
 0x20e   :  { %1835 = vperm.xlu0 %2406, %v3060_v19   ;;  %v926_v8 = vadd.f32 %v4574_v28, %v898_v56 }
 0x20f   :  { %v836_v46 = vadd.f32 %v828_v11, %v740_v21  ;;  %v869_v26 = vadd.f32 %v861_v41, %v837_v10  ;;  %v4579_v41 = vld [vmem:[#allocation14_spill] sm:$0xff]  ;;  %v935_v11 = vmax.f32 %v927_v53, 0.0 }
 0x210   :  { %v454_v7 = vpop.permute.xlu1 %453  ;;  %v3237_v1 = vpop.permute.xlu0 %423  ;;  %2401 = vset.pattern.permute.xlu1 %v4567_v30  ;;  %v4575_v30 = vld [vmem:[#allocation26_spill] sm:$0xff]  ;;  %v934_v38 = vmax.f32 %v926_v8, 0.0 }
 0x211   :  { %v868_v31 = vadd.f32 %v860_v6, %v836_v46  ;;  %v460_v48 = vsel %vm457_vm9, %v446_v55, %v454_v7  ;;  %v464_v25 = vsel %vm457_vm9, %v454_v7, %v446_v55  ;;  %v901_v54 = vadd.f32 %v893_v12, %v869_v26  ;;  %1671 = vperm.xlu1 %2401, %v3123_v60   ;;  %v4582_v7 = vld [vmem:[#allocation5_spill] sm:$0xff] }
 0x212   :  { %v470_v36 = vsel %vm55_vm8, %v460_v48, %v439_v32  ;;  %v479_v20 = vsel %vm58_vm10, %v435_v50, %v464_v25  ;;  %v566_v39 = vmul.f32 %v4573_v0, %v460_v48  ;;  %v703_v50 = vmul.f32 %v4579_v41, %v4578_v44 }
 0x213   :  { %v510_v40 = vmul.f32 %v2735_v3, %v470_v36  ;;  %v567_v22 = vmul.f32 %v4573_v0, %v479_v20  ;;  %v929_v42 = vadd.f32 %v4575_v30, %v901_v54  ;;  %v900_v33 = vadd.f32 %v892_v61, %v868_v31 }
 0x214   :  { %v591_v27 = vpop.permute.xlu1 %590  ;;  %v432_v13 = vpop.permute.xlu0 %431  ;;  %v4576_v3 = vmov 6   ;;  %v702_v26 = vmul.f32 %v4579_v41, %v4580_v24  ;;  %v4591_v24 = vld [vmem:[#allocation32_spill] sm:$0xff] }
 0x215   :  { %2407 = vset.pattern.permute.xlu0 %v4576_v3  ;;  %v542_v59 = vadd.f32 %v534_v43, %v510_v40  ;;  %v575_v57 = vadd.f32 %v567_v22, %v543_v15  ;;  %v3267_v2 = vsel %vm55_vm8, %v591_v27, %v3163_v49  ;;  %v608_v9 = vsel %vm55_vm8, %v3163_v49, %v591_v27  ;;  %v4584_v43 = vld [vmem:[#allocation15_spill] sm:$0xff] }
 0x216   :  { %1807 = vperm.xlu0 %2407, %v3123_v60   ;;  %v638_v16 = vsel %vm55_vm8, %v3259_v35, %v608_v9  ;;  %v671_v18 = vmul.f32 %v4577_v17, %v3267_v2  ;;  %2403 = vset.pattern.permute.xlu1 %v4576_v3  ;;  %v436_v21 = vsel %vm55_vm8, %v3237_v1, %v432_v13  ;;  %v937_v12 = vmax.f32 %v929_v42, 0.0  ;;  %v4585_v22 = vld [vmem:[#allocation7_spill] sm:$0xff] }
 0x217   :  { %v574_v55 = vadd.f32 %v566_v39, %v542_v59  ;;  %v670_v63 = vmul.f32 %v4577_v17, %v638_v16  ;;  %v928_v46 = vadd.f32 %v4575_v30, %v900_v33  ;;  %1799 = vperm.xlu1 %2403, %v3033_v4   ;;  %v513_v31 = vmul.f32 %v4582_v7, %v436_v21  ;;  %v4588_v16 = vld [vmem:[#allocation41_spill] sm:$0xff]  ;;  %v4589_v17 = vld [vmem:[#allocation18_spill] sm:$0xff] }
 0x218   :  { %v679_v49 = vadd.f32 %v671_v18, %v575_v57  ;;  %v3286_v10 = vpop.permute.xlu1 %776  ;;  %v448_v6 = vpop.permute.xlu0 %447  ;;  %v2319_v51 = vpack.c.bf16 %v937_v12, %v935_v11  ;;  %v537_v36 = vmul.f32 %v4584_v43, %v4583_v34  ;;  %v440_v40 = vsel %vm55_vm8, %v432_v13, %v3237_v1  ;;  %v4586_v57 = vld [vmem:[#allocation12_spill] sm:$0xff] }
 0x219   :  { %v678_v62 = vadd.f32 %v670_v63, %v574_v55  ;;  %v936_v47 = vmax.f32 %v928_v46, 0.0  ;;  %v4587_v9 = vmov 5   ;;  %v705_v18 = vmul.f32 %v4589_v17, %v4588_v16 }
 0x21a   :  { %2410 = vset.pattern.permute.xlu0 %v4581_v14  ;;  %v3293_v61 = vadd.f32 %v703_v50, %v679_v49  ;;  %2320 = vmatprep.subr.bf16.mxu1 %v2319_v51  ;;  %v545_v0 = vadd.f32 %v537_v36, %v513_v31  ;;  %v632_v51 = vsel %vm457_vm9, %v3217_v45, %v3195_v23  ;;  %v4593_v23 = vld [vmem:[#allocation17_spill] sm:$0xff]  ;;  %v4594_v34 = vmov 8  }
 0x21b   :  { %1931 = vperm.xlu0 %2410, %v3060_v19   ;;  %v3296_v32 = vadd.f32 %v702_v26, %v678_v62  ;;  %v2321_v48 = vpack.c.bf16 %v936_v47, %v934_v38  ;;  %1803 = vperm.xlu1 %2403, %v3060_v19   ;;  %v4592_v26 = vld [vmem:[#allocation43_spill] sm:$0xff] }
 0x21c   :  { %v593_v25 = vpop.permute.xlu1 %592  ;;  %v456_v54 = vpop.permute.xlu0 %455  ;;  %v768_v62 = vsel %vm55_vm8, %v4592_v26, %v4591_v24 }
 0x21d   :  { %v461_v20 = vsel %vm457_vm9, %v448_v6, %v456_v54  ;;  %v465_v56 = vsel %vm457_vm9, %v456_v54, %v448_v6  ;;  %2322 = vmatpush1.bf16.msra.mxu1 %v2321_v48 }
 0x21e   :  { %v481_v15 = vsel %vm58_vm10, %v436_v21, %v465_v56  ;;  %v472_v39 = vsel %vm55_vm8, %v461_v20, %v440_v40  ;;  %v568_v21 = vmul.f32 %v4585_v22, %v461_v20  ;;  %v4596_v56 = vld [vmem:[#allocation33_spill] sm:$0xff] }
 0x21f   :  { %v569_v53 = vmul.f32 %v4585_v22, %v481_v15  ;;  %1939 = vperm.xlu0 %2410, %v3078_v37   ;;  %2404 = vset.pattern.permute.xlu1 %v4568_v52  ;;  %v512_v13 = vmul.f32 %v4582_v7, %v472_v39  ;;  %v4590_v52 = vld [vmem:[#allocation38_spill] sm:$0xff]  ;;  %v647_v7 = vsel %vm58_vm10, %v3267_v2, %v632_v51  ;;  %v4597_v15 = vld [vmem:[#allocation44_spill] sm:$0xff]  ;;  %v4599_v39 = vld [vmem:[#allocation21_spill] sm:$0xff] }
 0x220   :  { %v601_v27 = vpop.permute.xlu1 %600  ;;  %v775_v42 = vpop.permute.xlu0 %774  ;;  %1779 = vperm.xlu1 %2404, %v3078_v37   ;;  %v536_v41 = vmul.f32 %v4584_v43, %v4590_v52  ;;  %v4595_v43 = vld [vmem:[#allocation40_spill] sm:$0xff]  ;;  %v769_v40 = vsel %vm55_vm8, %v4597_v15, %v4596_v56  ;;  %v4601_v52 = vld [vmem:[#allocation19_spill] sm:$0xff] }
 0x221   :  { %v577_v33 = vadd.f32 %v569_v53, %v545_v0  ;;  %v605_v59 = vsel %vm55_vm8, %v593_v25, %v601_v27  ;;  %v609_v6 = vsel %vm55_vm8, %v601_v27, %v593_v25  ;;  %v704_v2 = vmul.f32 %v4589_v17, %v4595_v43  ;;  %v4598_v0 = vld [vmem:[#allocation20_spill] sm:$0xff] }
 0x222   :  { %v673_v1 = vmul.f32 %v4586_v57, %v605_v59  ;;  %v544_v63 = vadd.f32 %v536_v41, %v512_v13  ;;  %v734_v22 = vmul.f32 %v4598_v0, %v3259_v35  ;;  %v735_v53 = vmul.f32 %v4598_v0, %v647_v7 }
 0x223   :  { %2414 = vset.pattern.permute.xlu0 %v4587_v9 }
 0x224   :  { %v681_v8 = vadd.f32 %v673_v1, %v577_v33  ;;  %v617_v44 = vpop.permute.xlu1 %616  ;;  %1959 = vperm.xlu0 %2414, %v3033_v4   ;;  %v783_v50 = vpop.permute.xlu0 %782  ;;  %2405 = vset.pattern.permute.xlu1 %v4569_v58  ;;  %v576_v31 = vadd.f32 %v568_v21, %v544_v63  ;;  %v765_v33 = vsel %vm55_vm8, %v4596_v56, %v4597_v15  ;;  %v4602_v21 = vld [vmem:[#allocation8_spill] sm:$0xff] }
 0x225   :  { %1831 = vperm.xlu1 %2405, %v3033_v4   ;;  %v788_v11 = vsel %vm457_vm9, %v775_v42, %v783_v50  ;;  %v743_v13 = vadd.f32 %v735_v53, %v3293_v61  ;;  %v742_v35 = vadd.f32 %v734_v22, %v3296_v32  ;;  %v792_v16 = vsel %vm457_vm9, %v783_v50, %v775_v42  ;;  %v4603_v61 = vld [vmem:[#allocation24_spill] sm:$0xff] }
 0x226   :  { %v713_v55 = vadd.f32 %v705_v18, %v681_v8  ;;  %v798_v48 = vsel %vm55_vm8, %v788_v11, %v768_v62  ;;  %v4600_v8 = vmov 0   ;;  %v833_v41 = vmul.f32 %v4601_v52, %v765_v33  ;;  %v4606_v62 = vld [vmem:[#allocation22_spill] sm:$0xff] }
 0x227   :  { %v830_v27 = vmul.f32 %v4599_v39, %v798_v48 }
 0x228   :  { %v625_v49 = vpop.permute.xlu1 %624  ;;  %1967 = vperm.xlu0 %2414, %v3123_v60  }
 0x229   :  { %v629_v12 = vsel %vm457_vm9, %v617_v44, %v625_v49  ;;  %v633_v46 = vsel %vm457_vm9, %v625_v49, %v617_v44  ;;  %2408 = vset.pattern.permute.xlu1 %v4576_v3  ;;  %v764_v3 = vsel %vm55_vm8, %v4591_v24, %v4592_v26  ;;  %v838_v63 = vadd.f32 %v830_v27, %v742_v35  ;;  %v4605_v26 = vld [vmem:[#allocation9_spill] sm:$0xff]  ;;  %v1194_v35 = vld [vmem:[%s4410_s0 + $0x30] sm:$0xff] }
 0x22a   :  { %v640_v38 = vsel %vm55_vm8, %v629_v12, %v609_v6  ;;  %v649_v47 = vsel %vm58_vm10, %v605_v59, %v633_v46  ;;  %1811 = vperm.xlu1 %2408, %v3078_v37   ;;  %v831_v44 = vmul.f32 %v4599_v39, %v764_v3  ;;  %v862_v6 = vmul.f32 %v4603_v61, %v4602_v21  ;;  %v4604_v46 = vld [vmem:[#allocation11_spill] sm:$0xff] }
 0x22b   :  { %v672_v25 = vmul.f32 %v4586_v57, %v640_v38  ;;  %v737_v45 = vmul.f32 %v4593_v23, %v649_v47  ;;  %v736_v57 = vmul.f32 %v4593_v23, %v629_v12  ;;  %v807_v32 = vsel %vm58_vm10, %v764_v3, %v792_v16  ;;  %v4607_v38 = vld [vmem:[#allocation13_spill] sm:$0xff]  ;;  %v1367_v21 = vld [vmem:[%s4411_s1 + $0x10] sm:$0xff] }
 0x22c   :  { %v785_v54 = vpop.permute.xlu1 %784  ;;  %2418 = vset.pattern.permute.xlu0 %v4594_v34  ;;  %v839_v42 = vadd.f32 %v831_v44, %v743_v13  ;;  %v863_v24 = vmul.f32 %v4603_v61, %v4604_v46  ;;  %v864_v51 = vmul.f32 %v4606_v62, %v4605_v26  ;;  %v865_v47 = vmul.f32 %v4606_v62, %v4607_v38  ;;  %v1192_v13 = vld [vmem:[%s4410_s0 + $0x10] sm:$0xff]  ;;  %v942_v16 = vld [vmem:[%s4413_s3] sm:$0xff]  ;;  %v1197_v44 = vld [vmem:[%s4410_s0 + $0x58] sm:$0x1] }
 0x22d   :  { %v680_v36 = vadd.f32 %v672_v25, %v576_v31  ;;  %v789_v20 = vsel %vm457_vm9, %v3286_v10, %v785_v54  ;;  %2003 = vperm.xlu0 %2418, %v3078_v37   ;;  %v745_v17 = vadd.f32 %v737_v45, %v713_v55  ;;  %v793_v55 = vsel %vm457_vm9, %v785_v54, %v3286_v10  ;;  %v4608_v31 = vld [vmem:[#allocation23_spill] sm:$0xff]  ;;  %v1368_v61 = vld [vmem:[%s4411_s1 + $0x18] sm:$0xff] }
 0x22e   :  { %v800_v1 = vsel %vm55_vm8, %v789_v20, %v769_v40  ;;  %2409 = vset.pattern.permute.xlu1 %v4581_v14  ;;  %v870_v7 = vadd.f32 %v862_v6, %v838_v63  ;;  %v895_v48 = vmul.f32 %v4608_v31, %v807_v32  ;;  %v809_v10 = vsel %vm58_vm10, %v765_v33, %v793_v55  ;;  %v945_v63 = vld [vmem:[%s4413_s3 + $0x18] sm:$0xff]  ;;  %v77_v6 = vld [vmem:[%s4412_s2] sm:$0xff]  ;;  %v78_v32 = vld [vmem:[%s4412_s2 + $0x8] sm:$0xff] }
 0x22f   :  { %v712_v59 = vadd.f32 %v704_v2, %v680_v36  ;;  %1927 = vperm.xlu1 %2409, %v3033_v4   ;;  %v832_v49 = vmul.f32 %v4601_v52, %v800_v1  ;;  %v841_v50 = vadd.f32 %v833_v41, %v745_v17  ;;  %v871_v25 = vadd.f32 %v863_v24, %v839_v42  ;;  %v4610_v2 = vld [vmem:[#allocation27_spill] sm:$0xff]  ;;  %v943_v52 = vld [vmem:[%s4413_s3 + $0x8] sm:$0xff] }
 0x230   :  { %v896_v36 = vmul.f32 %v4610_v2, %v789_v20  ;;  %v897_v56 = vmul.f32 %v4610_v2, %v809_v10  ;;  %v2329_v17 = vpack.c.bf16 %v1194_v35, %v1192_v13  ;;  %v1196_v41 = vld [vmem:[%s4410_s0 + $0x50] sm:$0x1]  ;;  %2265 = vmatmul.mubr.msk.f32.vlgmr.msra.gmra.mrb[0].mxu0 %vm85_vm1, %v77_v6 }
 0x231   :  { %v744_v18 = vadd.f32 %v736_v57, %v712_v59  ;;  %2419 = vset.pattern.permute.xlu0 %v4600_v8  ;;  %v873_v45 = vadd.f32 %v865_v47, %v841_v50  ;;  %v903_v43 = vadd.f32 %v895_v48, %v871_v25  ;;  %v79_v42 = vld [vmem:[%s4412_s2 + $0x10] sm:$0xff]  ;;  %v80_v25 = vld [vmem:[%s4412_s2 + $0x18] sm:$0xff] }
 0x232   :  { %2330 = vmatpush1.bf16.msra.mxu0 %v2329_v17 }
 0x233   :  { %v840_v12 = vadd.f32 %v832_v49, %v744_v18  ;;  %2411 = vset.pattern.permute.xlu1 %v4569_v58  ;;  %v894_v58 = vmul.f32 %v4608_v31, %v788_v11  ;;  %v905_v22 = vadd.f32 %v897_v56, %v873_v45  ;;  %v4612_v18 = vld [vmem:[#allocation42_spill] sm:$0xff]  ;;  %2287 = vmatprep.subr.msk.mxu0 %vm110_vm0, %v1197_v44 }
 0x234   :  { %1839 = vperm.xlu1 %2411, %v3123_v60   ;;  %v1366_v49 = vld [vmem:[%s4411_s1 + $0x8] sm:$0xff] }
 0x235   :  { %v872_v23 = vadd.f32 %v864_v51, %v840_v12  ;;  %v3415_v54 = vpop.permute.xlu0 %918  ;;  %v902_v3 = vadd.f32 %v894_v58, %v870_v7 }
 0x236   :  { %4609 = vst [vmem:[#allocation36_spill] sm:$0xff] %v3415_v54  ;;  %v931_v0 = vadd.f32 %v3415_v54, %v903_v43  ;;  %2288 = vmatpush1.msk.msra.mxu0 %vm110_vm0, %v1196_v41 }
 0x237   :  { %v904_v15 = vadd.f32 %v896_v36, %v872_v23  ;;  %v930_v40 = vadd.f32 %v3415_v54, %v902_v3 }
 0x238   :  { %1843 = vperm.xlu1 %2411, %v3078_v37   ;;  %v939_v33 = vmax.f32 %v931_v0, 0.0 }
 0x239   :  { %v938_v27 = vmax.f32 %v930_v40, 0.0 }
 0x23c   :  { %2412 = vset.pattern.permute.xlu1 %v4587_v9 }
 0x23d   :  { %v3422_v53 = vpop.permute.xlu1 %923  ;;  %1963 = vperm.xlu1 %2412, %v3060_v19  }
 0x23e   :  { %4611 = vst [vmem:[#allocation6_spill] sm:$0xff] %v3422_v53  ;;  %v932_v11 = vadd.f32 %v3422_v53, %v904_v15  ;;  %v933_v39 = vadd.f32 %v3422_v53, %v905_v22 }
 0x240   :  { %v940_v20 = vmax.f32 %v932_v11, 0.0  ;;  %v941_v59 = vmax.f32 %v933_v39, 0.0 }
 0x241   :  { %2413 = vset.pattern.permute.xlu1 %v4581_v14  ;;  %v4613_v14 = vmov 0.0  }
 0x242   :  { %v2323_v57 = vpack.c.bf16 %v941_v59, %v939_v33  ;;  %v2325_v1 = vpack.c.bf16 %v940_v20, %v938_v27  ;;  %1935 = vperm.xlu1 %2413, %v3123_v60   ;;  %187 = vmatprep.mubr.f32.mxu0 %v4613_v14  ;;  %v3545_v38 = vpop.permute.xlu1 %1604 }
 0x243   :  { %2266 = vmatmul.mubr.msk.f32.gmra.mrb[2].mxu0 %vm85_vm1, %v78_v32 }
 0x244   :  { %2324 = vmatprep.subr.bf16.mxu1 %v2323_v57  ;;  %193 = vmatprep.mubr.f32.mxu0 %v4613_v14 }
 0x245   :  { %2326 = vmatpush1.bf16.msra.mxu1 %v2325_v1 }
 0x246   :  { %2332 = vmatprep.subr.bf16.mxu1 %v4612_v18  ;;  %2415 = vset.pattern.permute.xlu1 %v4594_v34 }
 0x247   :  { %1991 = vperm.xlu1 %2415, %v3033_v4   ;;  %v944_v4 = vld [vmem:[%s4413_s3 + $0x10] sm:$0xff]  ;;  %2267 = vmatmul.mubr.msk.f32.gmra.mrb[4].mxu0 %vm85_vm1, %v79_v42  ;;  %v3553_v48 = vpop.permute.xlu1 %1631 }
 0x248   :  { %2279 = vmatmul.mubr.msk.f32.vlgmr.msra.gmra.mrb[16].mxu1 %vm1006_vm11, %v942_v16  ;;  %199 = vmatprep.mubr.f32.mxu0 %v4613_v14 }
 0x249   :  { %1101 = vmatprep.mubr.f32.mxu1 %v4613_v14  ;;  %2334 = vmatpush1.bf16.msra.mxu1 %v2329_v17 }
 0x24a   :  { %2297 = vmatprep.subr.msk.mxu1 %vm110_vm0, %v1197_v44 }
 0x24b   :  { %1995 = vperm.xlu1 %2415, %v3060_v19   ;;  %v946_v19 = vld [vmem:[%s4413_s3 + $0x20] sm:$0xff]  ;;  %2268 = vmatmul.mubr.msk.f32.gmra.mrb[6].mxu0 %vm85_vm1, %v80_v25 }
 0x24c   :  { %2280 = vmatmul.mubr.msk.f32.gmra.mrb[18].mxu1 %vm1006_vm11, %v943_v52  ;;  %1300 = vmatprep.mubr.f32.mxu0 %v4613_v14 }
 0x24d   :  { %1107 = vmatprep.mubr.f32.mxu1 %v4613_v14  ;;  %2298 = vmatpush1.msk.msra.mxu1 %vm110_vm0, %v1196_v41 }
 0x24f   :  { %2416 = vset.pattern.permute.xlu1 %v4587_v9  ;;  %v948_v9 = vld [vmem:[%s4413_s3 + $0x30] sm:$0xff]  ;;  %2289 = vmatmul.mubr.msk.f32.vlgmr.msra.gmra.mrb[8].mxu0 %vm85_vm1, %v77_v6 }
 0x250   :  { %2281 = vmatmul.mubr.msk.f32.gmra.mrb[20].mxu1 %vm1006_vm11, %v944_v4  ;;  %1971 = vperm.xlu1 %2416, %v3078_v37   ;;  %v947_v37 = vld [vmem:[%s4413_s3 + $0x28] sm:$0xff] }
 0x251   :  { %1113 = vmatprep.mubr.f32.mxu1 %v4613_v14  ;;  %1306 = vmatprep.mubr.f32.mxu0 %v4613_v14 }
 0x253   :  { %2290 = vmatmul.mubr.msk.f32.gmra.mrb[10].mxu0 %vm85_vm1, %v78_v32 }
 0x254   :  { %2282 = vmatmul.mubr.msk.f32.gmra.mrb[22].mxu1 %vm1006_vm11, %v945_v63  ;;  %2417 = vset.pattern.permute.xlu1 %v4594_v34 }
 0x255   :  { %1119 = vmatprep.mubr.f32.mxu1 %v4613_v14  ;;  %1999 = vperm.xlu1 %2417, %v3123_v60   ;;  %v949_v60 = vld [vmem:[%s4413_s3 + $0x38] sm:$0xff] }
 0x256   :  { %1312 = vmatprep.mubr.f32.mxu0 %v4613_v14 }
 0x257   :  { %2291 = vmatmul.mubr.msk.f32.gmra.mrb[12].mxu0 %vm85_vm1, %v79_v42 }
 0x258   :  { %2283 = vmatmul.mubr.msk.f32.gmra.mrb[24].mxu1 %vm1006_vm11, %v946_v19  ;;  %1318 = vmatprep.mubr.f32.mxu0 %v4613_v14 }
 0x259   :  { %1125 = vmatprep.mubr.f32.mxu1 %v4613_v14  ;;  %2420 = vset.pattern.permute.xlu1 %v4600_v8  ;;  %v1365_v8 = vld [vmem:[%s4411_s1] sm:$0xff] }
 0x25b   :  { %2292 = vmatmul.mubr.msk.f32.gmra.mrb[14].mxu0 %vm85_vm1, %v80_v25 }
 0x25c   :  { %2284 = vmatmul.mubr.msk.f32.gmra.mrb[26].mxu1 %vm1006_vm11, %v947_v37  ;;  %1324 = vmatprep.mubr.f32.mxu0 %v4613_v14 }
 0x25d   :  { %1131 = vmatprep.mubr.f32.mxu1 %v4613_v14 }
 0x260   :  { %2285 = vmatmul.mubr.msk.f32.gmra.mrb[28].mxu1 %vm1006_vm11, %v948_v9 }
 0x261   :  { %1137 = vmatprep.mubr.f32.mxu1 %v4613_v14 }
 0x264   :  { %2286 = vmatmul.mubr.msk.f32.gmra.mrb[30].mxu1 %vm1006_vm11, %v949_v60 }
 0x265   :  { %1445 = vmatprep.mubr.f32.mxu1 %v4613_v14 }
 0x268   :  { %2299 = vmatmul.mubr.msk.f32.vlgmr.msra.gmra.mrb[32].mxu1 %vm85_vm1, %v1365_v8 }
 0x269   :  { %1451 = vmatprep.mubr.f32.mxu1 %v4613_v14  ;;  %v3567_v45 = vpop.permute.xlu1 %1635  ;;  %v3648_v41 = vpop.permute.xlu0 %1609 }
 0x26c   :  { %2300 = vmatmul.mubr.msk.f32.gmra.mrb[34].mxu1 %vm85_vm1, %v1366_v49 }
 0x26d   :  { %1457 = vmatprep.mubr.f32.mxu1 %v4613_v14 }
 0x270   :  { %2301 = vmatmul.mubr.msk.f32.gmra.mrb[36].mxu1 %vm85_vm1, %v1367_v21 }
 0x271   :  { %1463 = vmatprep.mubr.f32.mxu1 %v4613_v14 }
 0x272   :  { %v3662_v19 = vpop.permute.xlu0 %1619 }
 0x273   :  { %4637 = vst [vmem:[#allocation8_spill] sm:$0xff] %v3662_v19 }
 0x274   :  { %2302 = vmatmul.mubr.msk.f32.gmra.mrb[38].mxu1 %vm85_vm1, %v1368_v61 }
 0x278   :  { %v3576_v36 = vpop.permute.xlu1 %1667  ;;  %v3670_v9 = vpop.permute.xlu0 %1663 }
 0x27c   :  { %v3676_v8 = vpop.permute.xlu0 %1675 }
 0x27d   :  { %v3587_v22 = vpop.permute.xlu1 %1614  ;;  %4639 = vst [vmem:[#allocation11_spill] sm:$0xff] %v3676_v8 }
 0x282   :  { %v3600_v33 = vpop.permute.xlu1 %1639 }
 0x283   :  { %4630 = vst [vmem:[#allocation17_spill] sm:$0xff] %v3600_v33 }
 0x284   :  { %v3680_v21 = vpop.permute.xlu0 %1767 }
 0x286   :  { %v3608_v1 = vpop.permute.xlu1 %1643 }
 0x287   :  { %4631 = vst [vmem:[#allocation40_spill] sm:$0xff] %v3608_v1 }
 0x288   :  { %v3684_v6 = vpop.permute.xlu0 %1775 }
 0x289   :  { %4641 = vst [vmem:[#allocation22_spill] sm:$0xff] %v3684_v6 }
 0x28b   :  { %v3618_v13 = vpop.permute.xlu1 %1771 }
 0x28d   :  { %v3688_v42 = vpop.permute.xlu0 %1835 }
 0x290   :  { %v3626_v16 = vpop.permute.xlu1 %1671 }
 0x291   :  { %4632 = vst [vmem:[#allocation33_spill] sm:$0xff] %v3626_v16 }
 0x296   :  { %v3640_v44 = vpop.permute.xlu1 %1799 }
 0x29a   :  { %v3650_v4 = vpop.permute.xlu1 %1803 }
 0x29f   :  { %v3664_v37 = vpop.permute.xlu1 %1779 }
 0x2a0   :  { %4638 = vst [vmem:[#allocation24_spill] sm:$0xff] %v3664_v37 }
 0x2a4   :  { %v3672_v60 = vpop.permute.xlu1 %1831 }
 0x2a9   :  { %v3678_v49 = vpop.permute.xlu1 %1811 }
 0x2aa   :  { %4640 = vst [vmem:[#allocation9_spill] sm:$0xff] %v3678_v49  ;;  %v63_v49 = vld [vmem:[%s4415_s5] sm:$0xff] }
 0x2ae   :  { %v3682_v61 = vpop.permute.xlu1 %1927 }
 0x2b3   :  { %v3686_v32 = vpop.permute.xlu1 %1839 }
 0x2b4   :  { %4642 = vst [vmem:[#allocation13_spill] sm:$0xff] %v3686_v32 }
 0x2b7   :  { %v3690_v25 = vpop.permute.xlu1 %1843 }
 0x2b8   :  { %4643 = vst [vmem:[#allocation23_spill] sm:$0xff] %v3690_v25 }
 0x31b   :  { %v3529_v50 = vpop.f32.mrb[16].mxu1 }
 0x31c   :  { %4614 = vst [vmem:[#allocation34_spill] sm:$0xff] %v3529_v50  ;;  %v3531_v55 = vpop.f32.mrb[17].mxu1 }
 0x31d   :  { %4615 = vst [vmem:[#allocation16_spill] sm:$0xff] %v3531_v55 }
 0x31f   :  { %v3533_v12 = vpop.f32.mrb[18].mxu1 }
 0x320   :  { %4616 = vst [vmem:[#allocation10_spill] sm:$0xff] %v3533_v12  ;;  %v3535_v46 = vpop.f32.mrb[19].mxu1 }
 0x321   :  { %4617 = vst [vmem:[#allocation35_spill] sm:$0xff] %v3535_v46 }
 0x323   :  { %v3537_v24 = vpop.f32.mrb[20].mxu1  ;;  %v4708_v5 = vld [vmem:[#allocation34_spill] sm:$0xff] }
 0x324   :  { %4618 = vst [vmem:[#allocation14_spill] sm:$0xff] %v3537_v24  ;;  %v3539_v26 = vpop.f32.mrb[21].mxu1 }
 0x325   :  { %4619 = vst [vmem:[#allocation37_spill] sm:$0xff] %v3539_v26 }
 0x327   :  { %v3541_v62 = vpop.f32.mrb[22].mxu1 }
 0x328   :  { %4620 = vst [vmem:[#allocation5_spill] sm:$0xff] %v3541_v62  ;;  %v3543_v51 = vpop.f32.mrb[23].mxu1 }
 0x329   :  { %4621 = vst [vmem:[#allocation39_spill] sm:$0xff] %v3543_v51 }
 0x32b   :  { %v3547_v47 = vpop.f32.mrb[24].mxu1 }
 0x32c   :  { %4622 = vst [vmem:[#allocation15_spill] sm:$0xff] %v3547_v47  ;;  %v3549_v7 = vpop.f32.mrb[25].mxu1 }
 0x32d   :  { %4623 = vst [vmem:[#allocation7_spill] sm:$0xff] %v3549_v7 }
 0x32f   :  { %v3551_v31 = vpop.f32.mrb[26].mxu1 }
 0x330   :  { %4624 = vst [vmem:[#allocation12_spill] sm:$0xff] %v3551_v31  ;;  %v3555_v10 = vpop.f32.mrb[27].mxu1 }
 0x331   :  { %4625 = vst [vmem:[#allocation41_spill] sm:$0xff] %v3555_v10 }
 0x333   :  { %v3562_v58 = vpop.f32.mrb[28].mxu1 }
 0x334   :  { %4626 = vst [vmem:[#allocation18_spill] sm:$0xff] %v3562_v58  ;;  %v3564_v23 = vpop.f32.mrb[29].mxu1 }
 0x335   :  { %4627 = vst [vmem:[#allocation38_spill] sm:$0xff] %v3564_v23 }
 0x337   :  { %v3570_v3 = vpop.f32.mrb[30].mxu1 }
 0x338   :  { %4628 = vst [vmem:[#allocation32_spill] sm:$0xff] %v3570_v3  ;;  %v3572_v43 = vpop.f32.mrb[31].mxu1 }
 0x339   :  { %4629 = vst [vmem:[#allocation43_spill] sm:$0xff] %v3572_v43 }
 0x33b   :  { %v1447_v2 = vpop.f32.mrb[32].mxu1 }
 0x33c   :  { %v3578_v56 = vmax.f32 %v1447_v2, 0.0  ;;  %v1449_v15 = vpop.f32.mrb[33].mxu1  ;;  %v3692_v2 = vpop.permute.xlu0 %1807 }
 0x33d   :  { %v3594_v39 = vmax.f32 %v1449_v15, 0.0  ;;  %4644 = vst [vmem:[#allocation27_spill] sm:$0xff] %v3692_v2  ;;  %v3694_v15 = vpop.permute.xlu1 %1963 }
 0x33e   :  { %1862 = vrot.lane.b32.xlu0 %v3578_v56, %s2458_s10  ;;  %1478 = vrot.lane.b32.xlu1 %v3578_v56, %s2457_s9 }
 0x33f   :  { %v1453_v40 = vpop.f32.mrb[34].mxu1 }
 0x340   :  { %v1455_v0 = vpop.f32.mrb[35].mxu1  ;;  %v3606_v57 = vmax.f32 %v1453_v40, 0.0 }
 0x341   :  { %v3620_v35 = vmax.f32 %v1455_v0, 0.0  ;;  %v3696_v40 = vpop.permute.xlu1 %1935  ;;  %v3698_v0 = vpop.permute.xlu0 %1931 }
 0x342   :  { %1886 = vrot.lane.b32.xlu0 %v3578_v56, %s2460_s12  ;;  %1502 = vrot.lane.b32.xlu1 %v3578_v56, %s2459_s11  ;;  %4645 = vst [vmem:[#allocation42_spill] sm:$0xff] %v3696_v40 }
 0x343   :  { %v1459_v11 = vpop.f32.mrb[36].mxu1 }
 0x344   :  { %v1461_v27 = vpop.f32.mrb[37].mxu1  ;;  %v3628_v17 = vmax.f32 %v1459_v11, 0.0 }
 0x345   :  { %v3656_v63 = vmax.f32 %v1461_v27, 0.0  ;;  %v3700_v11 = vpop.permute.xlu1 %1991  ;;  %v3702_v27 = vpop.permute.xlu0 %1939 }
 0x346   :  { %1870 = vrot.lane.b32.xlu0 %v3594_v39, %s2458_s10  ;;  %1486 = vrot.lane.b32.xlu1 %v3594_v39, %s2457_s9  ;;  %4633 = vst [vmem:[#allocation44_spill] sm:$0xff] %v3628_v17  ;;  %4646 = vst [vmem:[#allocation45_spill] sm:$0xff] %v3702_v27 }
 0x347   :  { %v1465_v20 = vpop.f32.mrb[38].mxu1  ;;  %4636 = vst [vmem:[#allocation19_spill] sm:$0xff] %v3656_v63 }
 0x348   :  { %v1467_v59 = vpop.f32.mrb[39].mxu1  ;;  %v3634_v18 = vmax.f32 %v1465_v20, 0.0 }
 0x349   :  { %v3646_v52 = vmax.f32 %v1467_v59, 0.0  ;;  %v3704_v20 = vpop.permute.xlu1 %1995  ;;  %v3706_v59 = vpop.permute.xlu0 %1959 }
 0x34a   :  { %1894 = vrot.lane.b32.xlu0 %v3594_v39, %s2460_s12  ;;  %1510 = vrot.lane.b32.xlu1 %v3594_v39, %s2459_s11  ;;  %4634 = vst [vmem:[#allocation20_spill] sm:$0xff] %v3634_v18 }
 0x34b   :  { %4635 = vst [vmem:[#allocation21_spill] sm:$0xff] %v3646_v52 }
 0x34d   :  { %v3708_v23 = vpop.permute.xlu0 %1967  ;;  %v3710_v58 = vpop.permute.xlu1 %1971 }
 0x34e   :  { %1864 = vrot.lane.b32.xlu1 %v3606_v57, %s2458_s10  ;;  %1480 = vrot.lane.b32.xlu0 %v3606_v57, %s2457_s9  ;;  %4647 = vst [vmem:[#allocation46_spill] sm:$0xff] %v3708_v23  ;;  %4648 = vst [vmem:[#allocation47_spill] sm:$0xff] %v3710_v58 }
 0x351   :  { %v3712_v7 = vpop.permute.xlu1 %1999  ;;  %v3714_v47 = vpop.permute.xlu0 %2003 }
 0x352   :  { %1888 = vrot.lane.b32.xlu1 %v3606_v57, %s2460_s12  ;;  %1504 = vrot.lane.b32.xlu0 %v3606_v57, %s2459_s11  ;;  %4649 = vst [vmem:[#allocation48_spill] sm:$0xff] %v3712_v7  ;;  %4650 = vst [vmem:[#allocation49_spill] sm:$0xff] %v3714_v47 }
 0x356   :  { %1872 = vrot.lane.b32.xlu1 %v3620_v35, %s2458_s10  ;;  %1488 = vrot.lane.b32.xlu0 %v3620_v35, %s2457_s9 }
 0x35a   :  { %1896 = vrot.lane.b32.xlu1 %v3620_v35, %s2460_s12  ;;  %1512 = vrot.lane.b32.xlu0 %v3620_v35, %s2459_s11 }
 0x35e   :  { %1482 = vrot.lane.b32.xlu1 %v3628_v17, %s2457_s9  ;;  %1484 = vrot.lane.b32.xlu0 %v3634_v18, %s2457_s9 }
 0x362   :  { %1506 = vrot.lane.b32.xlu1 %v3628_v17, %s2459_s11  ;;  %1508 = vrot.lane.b32.xlu0 %v3634_v18, %s2459_s11 }
 0x366   :  { %1866 = vrot.lane.b32.xlu1 %v3628_v17, %s2458_s10  ;;  %1492 = vrot.lane.b32.xlu0 %v3646_v52, %s2457_s9 }
 0x36a   :  { %1490 = vrot.lane.b32.xlu1 %v3656_v63, %s2457_s9  ;;  %1516 = vrot.lane.b32.xlu0 %v3646_v52, %s2459_s11 }
 0x36e   :  { %1514 = vrot.lane.b32.xlu1 %v3656_v63, %s2459_s11  ;;  %1874 = vrot.lane.b32.xlu0 %v3656_v63, %s2458_s10 }
 0x372   :  { %1868 = vrot.lane.b32.xlu1 %v3634_v18, %s2458_s10 }
 0x3b0   :  { %v1863_v26 = vpop.permute.xlu0 %1862  ;;  %v1479_v24 = vpop.permute.xlu1 %1478 }
 0x3b4   :  { %v1887_v43 = vpop.permute.xlu0 %1886  ;;  %v1503_v3 = vpop.permute.xlu1 %1502 }
 0x3b8   :  { %v1871_v46 = vpop.permute.xlu0 %1870  ;;  %v1487_v12 = vpop.permute.xlu1 %1486 }
 0x3b9   :  { %v3718_v10 = vsel %vm55_vm8, %v1863_v26, %v1871_v46  ;;  %v1882_v31 = vsel %vm55_vm8, %v1871_v46, %v1863_v26  ;;  %v1498_v53 = vsel %vm375_vm2, %v1487_v12, %v1479_v24  ;;  %v1494_v25 = vsel %vm375_vm2, %v1479_v24, %v1487_v12 }
 0x3bc   :  { %v1895_v51 = vpop.permute.xlu0 %1894  ;;  %v1511_v62 = vpop.permute.xlu1 %1510 }
 0x3bd   :  { %v3726_v54 = vsel %vm457_vm9, %v1887_v43, %v1895_v51  ;;  %v1906_v55 = vsel %vm457_vm9, %v1895_v51, %v1887_v43  ;;  %v1518_v50 = vsel %vm400_vm3, %v1503_v3, %v1511_v62  ;;  %v1522_v51 = vsel %vm400_vm3, %v1511_v62, %v1503_v3 }
 0x3be   :  { %v3735_v47 = vsel %vm55_vm8, %v3726_v54, %v1882_v31  ;;  %v3740_v46 = vsel %vm58_vm10, %v3718_v10, %v1906_v55  ;;  %v3744_v58 = vsel %vm2815_vm5, %v1518_v50, %v1498_v53  ;;  %v3752_v27 = vsel %vm2811_vm4, %v1498_v53, %v1518_v50 }
 0x3bf   :  { %1534 = vrot.lane.b32.xlu1 %v3744_v58, %s2458_s10  ;;  %1702 = vrot.lane.b32.xlu0 %v3752_v27, %s2458_s10  ;;  %v3760_v7 = vsel %vm2844_vm7, %v1522_v51, %v1494_v25  ;;  %v3766_v3 = vsel %vm2840_vm6, %v1494_v25, %v1522_v51 }
 0x3c0   :  { %v1865_v31 = vpop.permute.xlu1 %1864  ;;  %v1481_v55 = vpop.permute.xlu0 %1480 }
 0x3c3   :  { %1542 = vrot.lane.b32.xlu1 %v3760_v7, %s2458_s10  ;;  %1710 = vrot.lane.b32.xlu0 %v3766_v3, %s2458_s10 }
 0x3c4   :  { %v1889_v53 = vpop.permute.xlu1 %1888  ;;  %v1505_v50 = vpop.permute.xlu0 %1504 }
 0x3c7   :  { %1558 = vrot.lane.b32.xlu1 %v3744_v58, %s2460_s12  ;;  %1726 = vrot.lane.b32.xlu0 %v3752_v27, %s2460_s12 }
 0x3c8   :  { %v1873_v12 = vpop.permute.xlu1 %1872  ;;  %v1489_v24 = vpop.permute.xlu0 %1488 }
 0x3c9   :  { %v3776_v37 = vsel %vm55_vm8, %v1865_v31, %v1873_v12  ;;  %v1883_v25 = vsel %vm55_vm8, %v1873_v12, %v1865_v31  ;;  %v1499_v19 = vsel %vm375_vm2, %v1489_v24, %v1481_v55 }
 0x3cb   :  { %1566 = vrot.lane.b32.xlu1 %v3760_v7, %s2460_s12  ;;  %1734 = vrot.lane.b32.xlu0 %v3766_v3, %s2460_s12 }
 0x3cc   :  { %v1897_v51 = vpop.permute.xlu1 %1896  ;;  %v1513_v8 = vpop.permute.xlu0 %1512 }
 0x3cd   :  { %v3788_v1 = vsel %vm457_vm9, %v1889_v53, %v1897_v51  ;;  %v1907_v23 = vsel %vm457_vm9, %v1897_v51, %v1889_v53  ;;  %v1519_v31 = vsel %vm400_vm3, %v1505_v50, %v1513_v8  ;;  %v1523_v53 = vsel %vm400_vm3, %v1513_v8, %v1505_v50 }
 0x3ce   :  { %v3797_v12 = vsel %vm55_vm8, %v3788_v1, %v1883_v25  ;;  %v3802_v40 = vsel %vm58_vm10, %v3776_v37, %v1907_v23  ;;  %v3806_v32 = vsel %vm2811_vm4, %v1499_v19, %v1519_v31  ;;  %v3814_v51 = vsel %vm2815_vm5, %v1519_v31, %v1499_v19 }
 0x3cf   :  { %4655 = vst [vmem:[#allocation29_spill] sm:$0xff] %v3802_v40  ;;  %1704 = vrot.lane.b32.xlu1 %v3806_v32, %s2458_s10  ;;  %1536 = vrot.lane.b32.xlu0 %v3814_v51, %s2458_s10  ;;  %v1495_v23 = vsel %vm375_vm2, %v1481_v55, %v1489_v24 }
 0x3d0   :  { %v1483_v25 = vpop.permute.xlu1 %1482  ;;  %v3822_v2 = vsel %vm2840_vm6, %v1495_v23, %v1523_v53  ;;  %v3828_v8 = vsel %vm2844_vm7, %v1523_v53, %v1495_v23  ;;  %v1485_v50 = vpop.permute.xlu0 %1484 }
 0x3d3   :  { %1712 = vrot.lane.b32.xlu1 %v3822_v2, %s2458_s10  ;;  %1544 = vrot.lane.b32.xlu0 %v3828_v8, %s2458_s10 }
 0x3d4   :  { %v1507_v19 = vpop.permute.xlu1 %1506  ;;  %v1509_v24 = vpop.permute.xlu0 %1508 }
 0x3d7   :  { %1728 = vrot.lane.b32.xlu1 %v3806_v32, %s2460_s12  ;;  %1560 = vrot.lane.b32.xlu0 %v3814_v51, %s2460_s12 }
 0x3d8   :  { %v3836_v55 = vpop.permute.xlu1 %1866  ;;  %v1493_v6 = vpop.permute.xlu0 %1492 }
 0x3d9   :  { %4656 = vst [vmem:[#allocation28_spill] sm:$0xff] %v3836_v55 }
 0x3db   :  { %1736 = vrot.lane.b32.xlu1 %v3822_v2, %s2460_s12  ;;  %1568 = vrot.lane.b32.xlu0 %v3828_v8, %s2460_s12 }
 0x3dc   :  { %v1491_v31 = vpop.permute.xlu1 %1490 }
 0x3dd   :  { %v1496_v23 = vsel %vm375_vm2, %v1483_v25, %v1491_v31  ;;  %v1500_v30 = vsel %vm375_vm2, %v1491_v31, %v1483_v25 }
 0x3e0   :  { %v1515_v53 = vpop.permute.xlu1 %1514 }
 0x3e1   :  { %v1520_v28 = vsel %vm400_vm3, %v1507_v19, %v1515_v53  ;;  %v1524_v55 = vsel %vm400_vm3, %v1515_v53, %v1507_v19  ;;  %v1517_v19 = vpop.permute.xlu0 %1516  ;;  %v1501_v53 = vsel %vm375_vm2, %v1493_v6, %v1485_v50 }
 0x3e2   :  { %v3852_v16 = vsel %vm2815_vm5, %v1520_v28, %v1500_v30  ;;  %v3856_v33 = vsel %vm2844_vm7, %v1524_v55, %v1496_v23  ;;  %v3864_v25 = vsel %vm2811_vm4, %v1500_v30, %v1520_v28  ;;  %v3872_v31 = vsel %vm2840_vm6, %v1496_v23, %v1524_v55 }
 0x3e3   :  { %1538 = vrot.lane.b32.xlu1 %v3852_v16, %s2458_s10  ;;  %1546 = vrot.lane.b32.xlu0 %v3856_v33, %s2458_s10  ;;  %v1521_v40 = vsel %vm400_vm3, %v1509_v24, %v1517_v19  ;;  %v1497_v30 = vsel %vm375_vm2, %v1485_v50, %v1493_v6  ;;  %v1525_v55 = vsel %vm400_vm3, %v1517_v19, %v1509_v24  ;;  %v66_v50 = vld [vmem:[%s4415_s5 + $0x18] sm:$0xff]  ;;  %v1202_v24 = vld [vmem:[%s4412_s2 + $0x20] sm:$0xff] }
 0x3e4   :  { %v3884_v28 = vsel %vm2811_vm4, %v1501_v53, %v1521_v40  ;;  %v3896_v23 = vsel %vm2840_vm6, %v1497_v30, %v1525_v55  ;;  %v3904_v6 = vsel %vm2815_vm5, %v1521_v40, %v1501_v53  ;;  %v3912_v43 = vsel %vm2844_vm7, %v1525_v55, %v1497_v30  ;;  %v3929_v40 = vpop.f32.mrb[0].mxu0  ;;  %2293 = vmatmul.mubr.msk.f32.gmra.mrb[16].mxu0 %vm85_vm1, %v1202_v24  ;;  %v68_v19 = vld [vmem:[%s4415_s5 + $0x28] sm:$0xff] }
 0x3e5   :  { %4657 = vst [vmem:[#allocation31_spill] sm:$0xff] %v3884_v28  ;;  %4658 = vst [vmem:[#allocation30_spill] sm:$0xff] %v3896_v23  ;;  %v3931_v26 = vpop.f32.mrb[1].mxu0  ;;  %1330 = vmatprep.mubr.f32.mxu0 %v4613_v14  ;;  %v1203_v53 = vld [vmem:[%s4412_s2 + $0x28] sm:$0xff] }
 0x3e6   :  { %4659 = vst [vmem:[#allocation50_spill] sm:$0xff] %v3904_v6  ;;  %4660 = vst [vmem:[#allocation51_spill] sm:$0xff] %v3912_v43  ;;  %v3933_v62 = vpop.f32.mrb[2].mxu0 }
 0x3e7   :  { %1706 = vrot.lane.b32.xlu1 %v3864_v25, %s2458_s10  ;;  %1562 = vrot.lane.b32.xlu0 %v3852_v16, %s2460_s12  ;;  %4661 = vst [vmem:[#allocation52_spill] sm:$0xff] %v3929_v40  ;;  %4662 = vst [vmem:[#allocation53_spill] sm:$0xff] %v3931_v26  ;;  %v3953_v30 = vpop.f32.mrb[3].mxu0 }
 0x3e8   :  { %4663 = vst [vmem:[#allocation54_spill] sm:$0xff] %v3933_v62  ;;  %4664 = vst [vmem:[#allocation55_spill] sm:$0xff] %v3953_v30  ;;  %2294 = vmatmul.mubr.msk.f32.gmra.mrb[18].mxu0 %vm85_vm1, %v1203_v53  ;;  %v3958_v55 = vpop.f32.mrb[4].mxu0  ;;  %v3995_v62 = vpop.permute.xlu0 %1874 }
 0x3e9   :  { %4665 = vst [vmem:[#allocation56_spill] sm:$0xff] %v3958_v55  ;;  %v3966_v24 = vpop.f32.mrb[5].mxu0  ;;  %1336 = vmatprep.mubr.f32.mxu0 %v4613_v14  ;;  %v65_v55 = vld [vmem:[%s4415_s5 + $0x10] sm:$0xff] }
 0x3ea   :  { %4666 = vst [vmem:[#allocation57_spill] sm:$0xff] %v3966_v24  ;;  %v3969_v30 = vpop.f32.mrb[6].mxu0  ;;  %v1205_v24 = vld [vmem:[%s4412_s2 + $0x38] sm:$0xff] }
 0x3eb   :  { %1714 = vrot.lane.b32.xlu1 %v3872_v31, %s2458_s10  ;;  %1570 = vrot.lane.b32.xlu0 %v3856_v33, %s2460_s12  ;;  %4667 = vst [vmem:[#allocation58_spill] sm:$0xff] %v3969_v30  ;;  %v3974_v53 = vpop.f32.mrb[7].mxu0 }
 0x3ec   :  { %4668 = vst [vmem:[#allocation59_spill] sm:$0xff] %v3974_v53 }
 0x3ef   :  { %1730 = vrot.lane.b32.xlu1 %v3864_v25, %s2460_s12  ;;  %1708 = vrot.lane.b32.xlu0 %v3884_v28, %s2458_s10 }
 0x3f3   :  { %1738 = vrot.lane.b32.xlu1 %v3872_v31, %s2460_s12  ;;  %1716 = vrot.lane.b32.xlu0 %v3896_v23, %s2458_s10 }
 0x3f7   :  { %1732 = vrot.lane.b32.xlu0 %v3884_v28, %s2460_s12  ;;  %1540 = vrot.lane.b32.xlu1 %v3904_v6, %s2458_s10 }
 0x3fb   :  { %1740 = vrot.lane.b32.xlu0 %v3896_v23, %s2460_s12  ;;  %1548 = vrot.lane.b32.xlu1 %v3912_v43, %s2458_s10 }
 0x3ff   :  { %1890 = vrot.lane.b32.xlu0 %v3628_v17, %s2460_s12  ;;  %1564 = vrot.lane.b32.xlu1 %v3904_v6, %s2460_s12 }
 0x403   :  { %1898 = vrot.lane.b32.xlu0 %v3656_v63, %s2460_s12  ;;  %1572 = vrot.lane.b32.xlu1 %v3912_v43, %s2460_s12 }
 0x407   :  { %968 = vperm.xlu0 %2419, %v63_v49   ;;  %1876 = vrot.lane.b32.xlu1 %v3646_v52, %s2458_s10  ;;  %v70_v49 = vld [vmem:[%s4415_s5 + $0x38] sm:$0xff] }
 0x40b   :  { %983 = vperm.xlu0 %2419, %v66_v50   ;;  %1892 = vrot.lane.b32.xlu1 %v3634_v18, %s2460_s12  ;;  %v64_v50 = vld [vmem:[%s4415_s5 + $0x8] sm:$0xff] }
 0x40f   :  { %993 = vperm.xlu0 %2419, %v68_v19   ;;  %1900 = vrot.lane.b32.xlu1 %v3646_v52, %s2460_s12  ;;  %v1204_v19 = vld [vmem:[%s4412_s2 + $0x30] sm:$0xff] }
 0x410   :  { %2295 = vmatmul.mubr.msk.f32.gmra.mrb[20].mxu0 %vm85_vm1, %v1204_v19  ;;  %v3993_v19 = vpop.permute.xlu1 %1868 }
 0x411   :  { %1342 = vmatprep.mubr.f32.mxu0 %v4613_v14  ;;  %4669 = vst [vmem:[#allocation60_spill] sm:$0xff] %v3993_v19 }
 0x413   :  { %1003 = vperm.xlu0 %2419, %v70_v49   ;;  %973 = vperm.xlu1 %2420, %v64_v50   ;;  %v67_v49 = vld [vmem:[%s4415_s5 + $0x20] sm:$0xff]  ;;  %v69_v50 = vld [vmem:[%s4415_s5 + $0x30] sm:$0xff] }
 0x414   :  { %2296 = vmatmul.mubr.msk.f32.gmra.mrb[22].mxu0 %vm85_vm1, %v1205_v24 }
 0x415   :  { %2150 = vmatprep.mubr.f32.mxu0 %v4613_v14 }
 0x417   :  { %978 = vperm.xlu1 %2420, %v65_v55   ;;  %2421 = vset.pattern.permute.xlu0 %v4594_v34  ;;  %v3997_v55 = vpop.f32.mrb[8].mxu0 }
 0x418   :  { %4670 = vst [vmem:[#allocation61_spill] sm:$0xff] %v3997_v55  ;;  %v3999_v53 = vpop.f32.mrb[9].mxu0 }
 0x419   :  { %4671 = vst [vmem:[#allocation62_spill] sm:$0xff] %v3999_v53  ;;  %v4001_v30 = vpop.f32.mrb[10].mxu0 }
 0x41a   :  { %4672 = vst [vmem:[#allocation63_spill] sm:$0xff] %v4001_v30  ;;  %v4003_v26 = vpop.f32.mrb[11].mxu0 }
 0x41b   :  { %988 = vperm.xlu1 %2420, %v67_v49   ;;  %4673 = vst [vmem:[#allocation64_spill] sm:$0xff] %v4003_v26  ;;  %v4005_v49 = vpop.f32.mrb[12].mxu0  ;;  %v1646_v26 = vmul.f32 %v3553_v48, %v3744_v58 }
 0x41c   :  { %4674 = vst [vmem:[#allocation65_spill] sm:$0xff] %v4005_v49  ;;  %v4007_v18 = vpop.f32.mrb[13].mxu0  ;;  %v1647_v49 = vmul.f32 %v3553_v48, %v3760_v7 }
 0x41d   :  { %4675 = vst [vmem:[#allocation66_spill] sm:$0xff] %v4007_v18 }
 0x41f   :  { %998 = vperm.xlu1 %2420, %v69_v50   ;;  %v4009_v50 = vpop.f32.mrb[14].mxu0 }
 0x420   :  { %4676 = vst [vmem:[#allocation67_spill] sm:$0xff] %v4009_v50  ;;  %v4011_v52 = vpop.f32.mrb[15].mxu0 }
 0x421   :  { %4677 = vst [vmem:[#allocation68_spill] sm:$0xff] %v4011_v52 }
 0x431   :  { %v1535_v24 = vpop.permute.xlu1 %1534  ;;  %v1703_v14 = vpop.permute.xlu0 %1702 }
 0x435   :  { %v1543_v34 = vpop.permute.xlu1 %1542  ;;  %v1711_v40 = vpop.permute.xlu0 %1710 }
 0x436   :  { %v1550_v55 = vsel %vm55_vm8, %v1535_v24, %v1543_v34  ;;  %v1554_v18 = vsel %vm55_vm8, %v1543_v34, %v1535_v24  ;;  %v1718_v52 = vsel %vm55_vm8, %v1703_v14, %v1711_v40  ;;  %v1722_v58 = vsel %vm55_vm8, %v1711_v40, %v1703_v14 }
 0x437   :  { %v1623_v53 = vmul.f32 %v3545_v38, %v1550_v55 }
 0x439   :  { %v1559_v17 = vpop.permute.xlu1 %1558  ;;  %v1727_v28 = vpop.permute.xlu0 %1726  ;;  %v1655_v34 = vadd.f32 %v1647_v49, %v1623_v53 }
 0x43d   :  { %v1567_v30 = vpop.permute.xlu1 %1566  ;;  %v1735_v23 = vpop.permute.xlu0 %1734 }
 0x43e   :  { %v1574_v50 = vsel %vm457_vm9, %v1559_v17, %v1567_v30  ;;  %v1578_v19 = vsel %vm457_vm9, %v1567_v30, %v1559_v17  ;;  %v1742_v24 = vsel %vm457_vm9, %v1727_v28, %v1735_v23  ;;  %v1746_v17 = vsel %vm457_vm9, %v1735_v23, %v1727_v28 }
 0x43f   :  { %v1582_v7 = vsel %vm55_vm8, %v1574_v50, %v1554_v18  ;;  %v1591_v48 = vsel %vm58_vm10, %v1550_v55, %v1578_v19  ;;  %v1750_v14 = vsel %vm55_vm8, %v1742_v24, %v1722_v58  ;;  %v1783_v18 = vmul.f32 %v3680_v21, %v1718_v52 }
 0x440   :  { %v1622_v43 = vmul.f32 %v3545_v38, %v1582_v7  ;;  %v1679_v6 = vmul.f32 %v3670_v9, %v1591_v48  ;;  %v1678_v19 = vmul.f32 %v3670_v9, %v1574_v50  ;;  %v1759_v53 = vsel %vm58_vm10, %v1718_v52, %v1746_v17 }
 0x441   :  { %v1705_v40 = vpop.permute.xlu1 %1704  ;;  %v1537_v63 = vpop.permute.xlu0 %1536  ;;  %v1815_v38 = vmul.f32 %v3640_v44, %v3766_v3  ;;  %v1782_v28 = vmul.f32 %v3680_v21, %v1750_v14  ;;  %v1814_v58 = vmul.f32 %v3640_v44, %v3752_v27  ;;  %v1847_v9 = vmul.f32 %v3672_v60, %v1759_v53 }
 0x442   :  { %v1654_v30 = vadd.f32 %v1646_v26, %v1622_v43  ;;  %v1687_v55 = vadd.f32 %v1679_v6, %v1655_v34  ;;  %v1943_v26 = vmul.f32 %v3682_v61, %v3718_v10  ;;  %v1846_v50 = vmul.f32 %v3672_v60, %v1742_v24 }
 0x443   :  { %v1975_v21 = vmul.f32 %v3706_v59, %v3594_v39  ;;  %v1942_v17 = vmul.f32 %v3682_v61, %v3735_v47  ;;  %v1974_v10 = vmul.f32 %v3706_v59, %v3578_v56  ;;  %v2007_v60 = vmul.f32 %v3700_v11, %v3740_v46 }
 0x444   :  { %v1686_v49 = vadd.f32 %v1678_v19, %v1654_v30  ;;  %v1791_v7 = vadd.f32 %v1783_v18, %v1687_v55  ;;  %v2006_v39 = vmul.f32 %v3700_v11, %v3726_v54  ;;  %v1649_v56 = vmul.f32 %v3567_v45, %v3828_v8 }
 0x445   :  { %v1713_v23 = vpop.permute.xlu1 %1712  ;;  %v1545_v6 = vpop.permute.xlu0 %1544 }
 0x446   :  { %v1823_v48 = vadd.f32 %v1815_v38, %v1791_v7  ;;  %v1790_v43 = vadd.f32 %v1782_v28, %v1686_v49  ;;  %v1551_v18 = vsel %vm55_vm8, %v1537_v63, %v1545_v6  ;;  %v1648_v38 = vmul.f32 %v3567_v45, %v3814_v51 }
 0x447   :  { %v1625_v47 = vmul.f32 %v3648_v41, %v1551_v18  ;;  %v1555_v54 = vsel %vm55_vm8, %v1545_v6, %v1537_v63  ;;  %v1719_v51 = vsel %vm55_vm8, %v1705_v40, %v1713_v23  ;;  %v1723_v45 = vsel %vm55_vm8, %v1713_v23, %v1705_v40 }
 0x448   :  { %v1822_v52 = vadd.f32 %v1814_v58, %v1790_v43  ;;  %v1855_v3 = vadd.f32 %v1847_v9, %v1823_v48  ;;  %v1785_v9 = vmul.f32 %v3618_v13, %v1719_v51 }
 0x449   :  { %v1729_v34 = vpop.permute.xlu1 %1728  ;;  %v1561_v14 = vpop.permute.xlu0 %1560  ;;  %v1657_v28 = vadd.f32 %v1649_v56, %v1625_v47 }
 0x44a   :  { %v1854_v44 = vadd.f32 %v1846_v50, %v1822_v52  ;;  %v1951_v27 = vadd.f32 %v1943_v26, %v1855_v3  ;;  %v1817_v3 = vmul.f32 %v3650_v4, %v3822_v2 }
 0x44c   :  { %v1950_v24 = vadd.f32 %v1942_v17, %v1854_v44  ;;  %v1983_v30 = vadd.f32 %v1975_v21, %v1951_v27  ;;  %v1816_v17 = vmul.f32 %v3650_v4, %v3806_v32 }
 0x44d   :  { %v1737_v19 = vpop.permute.xlu1 %1736  ;;  %v1569_v61 = vpop.permute.xlu0 %1568 }
 0x44e   :  { %v1982_v55 = vadd.f32 %v1974_v10, %v1950_v24  ;;  %v4068_v53 = vadd.f32 %v2007_v60, %v1983_v30  ;;  %v1575_v59 = vsel %vm457_vm9, %v1561_v14, %v1569_v61  ;;  %v1743_v11 = vsel %vm457_vm9, %v1729_v34, %v1737_v19 }
 0x44f   :  { %v1579_v49 = vsel %vm457_vm9, %v1569_v61, %v1561_v14  ;;  %v1584_v8 = vsel %vm55_vm8, %v1575_v59, %v1555_v54  ;;  %v1747_v63 = vsel %vm457_vm9, %v1737_v19, %v1729_v34  ;;  %v1752_v43 = vsel %vm55_vm8, %v1743_v11, %v1723_v45  ;;  %v4678_v61 = vld [vmem:[#allocation29_spill] sm:$0xff] }
 0x450   :  { %v4076_v46 = vadd.f32 %v2006_v39, %v1982_v55  ;;  %v1593_v7 = vsel %vm58_vm10, %v1551_v18, %v1579_v49  ;;  %v1624_v58 = vmul.f32 %v3648_v41, %v1584_v8  ;;  %v1680_v23 = vmul.f32 %v3576_v36, %v1575_v59  ;;  %v4680_v45 = vld [vmem:[#allocation33_spill] sm:$0xff] }
 0x451   :  { %v1681_v48 = vmul.f32 %v3576_v36, %v1593_v7  ;;  %v1761_v26 = vsel %vm58_vm10, %v1719_v51, %v1747_v63  ;;  %v1784_v41 = vmul.f32 %v3618_v13, %v1752_v43  ;;  %v1945_v14 = vmul.f32 %v3698_v0, %v3776_v37 }
 0x452   :  { %v1656_v40 = vadd.f32 %v1648_v38, %v1624_v58  ;;  %v1849_v44 = vmul.f32 %v3688_v42, %v1761_v26  ;;  %v1848_v60 = vmul.f32 %v3688_v42, %v1743_v11  ;;  %v1944_v30 = vmul.f32 %v3698_v0, %v3797_v12  ;;  %v4679_v12 = vld [vmem:[#allocation17_spill] sm:$0xff] }
 0x453   :  { %v1689_v6 = vadd.f32 %v1681_v48, %v1657_v28  ;;  %v1976_v19 = vmul.f32 %v3694_v15, %v3606_v57  ;;  %v1977_v37 = vmul.f32 %v3694_v15, %v3620_v35  ;;  %v2008_v39 = vmul.f32 %v3704_v20, %v3788_v1  ;;  %v4681_v48 = vld [vmem:[#allocation22_spill] sm:$0xff] }
 0x454   :  { %v1688_v34 = vadd.f32 %v1680_v23, %v1656_v40  ;;  %v2009_v38 = vmul.f32 %v3704_v20, %v4678_v61  ;;  %v1651_v35 = vmul.f32 %v4679_v12, %v3856_v33  ;;  %v1650_v28 = vmul.f32 %v4679_v12, %v3852_v16  ;;  %v4682_v40 = vld [vmem:[#allocation25_spill] sm:$0xff] }
 0x455   :  { %v1539_v52 = vpop.permute.xlu1 %1538  ;;  %v1547_v50 = vpop.permute.xlu0 %1546  ;;  %v1793_v21 = vadd.f32 %v1785_v9, %v1689_v6  ;;  %v2023_v23 = vadd.f32 %v4068_v53, %v4682_v40 }
 0x456   :  { %v1792_v27 = vadd.f32 %v1784_v41, %v1688_v34  ;;  %v1552_v13 = vsel %vm55_vm8, %v1539_v52, %v1547_v50  ;;  %v1556_v0 = vsel %vm55_vm8, %v1547_v50, %v1539_v52  ;;  %v4684_v52 = vld [vmem:[#allocation26_spill] sm:$0xff] }
 0x457   :  { %v1825_v36 = vadd.f32 %v1817_v3, %v1793_v21  ;;  %v1627_v42 = vmul.f32 %v3587_v22, %v1552_v13  ;;  %v4685_v3 = vld [vmem:[#allocation27_spill] sm:$0xff] }
 0x458   :  { %v1824_v24 = vadd.f32 %v1816_v17, %v1792_v27  ;;  %v1819_v16 = vmul.f32 %v4685_v3, %v3872_v31  ;;  %v2022_v17 = vadd.f32 %v4076_v46, %v4682_v40 }
 0x459   :  { %v1707_v18 = vpop.permute.xlu1 %1706  ;;  %v1563_v10 = vpop.permute.xlu0 %1562  ;;  %v1857_v2 = vadd.f32 %v1849_v44, %v1825_v36  ;;  %v1659_v51 = vadd.f32 %v1651_v35, %v1627_v42 }
 0x45a   :  { %v1856_v4 = vadd.f32 %v1848_v60, %v1824_v24  ;;  %v2031_v60 = vmax.f32 %v2023_v23, 0.0 }
 0x45b   :  { %v1953_v32 = vadd.f32 %v1945_v14, %v1857_v2 }
 0x45c   :  { %v1952_v56 = vadd.f32 %v1944_v30, %v1856_v4  ;;  %v4687_v4 = vld [vmem:[#allocation42_spill] sm:$0xff] }
 0x45d   :  { %v1715_v55 = vpop.permute.xlu1 %1714  ;;  %v1571_v47 = vpop.permute.xlu0 %1570  ;;  %v1985_v11 = vadd.f32 %v1977_v37, %v1953_v32 }
 0x45e   :  { %v1576_v57 = vsel %vm457_vm9, %v1563_v10, %v1571_v47  ;;  %v1720_v1 = vsel %vm55_vm8, %v1707_v18, %v1715_v55  ;;  %v1580_v15 = vsel %vm457_vm9, %v1571_v47, %v1563_v10  ;;  %v1984_v49 = vadd.f32 %v1976_v19, %v1952_v56 }
 0x45f   :  { %v1586_v59 = vsel %vm55_vm8, %v1576_v57, %v1556_v0  ;;  %v1595_v20 = vsel %vm58_vm10, %v1552_v13, %v1580_v15  ;;  %v2017_v63 = vadd.f32 %v2009_v38, %v1985_v11  ;;  %v1787_v43 = vmul.f32 %v4681_v48, %v1720_v1 }
 0x460   :  { %v1626_v54 = vmul.f32 %v3587_v22, %v1586_v59  ;;  %v1683_v8 = vmul.f32 %v4680_v45, %v1595_v20  ;;  %v2016_v58 = vadd.f32 %v2008_v39, %v1984_v49  ;;  %v4683_v22 = vld [vmem:[#allocation28_spill] sm:$0xff]  ;;  %v1724_v44 = vsel %vm55_vm8, %v1715_v55, %v1707_v18  ;;  %v4686_v18 = vld [vmem:[#allocation13_spill] sm:$0xff]  ;;  %v4688_v20 = vld [vmem:[#allocation19_spill] sm:$0xff] }
 0x461   :  { %v1731_v33 = vpop.permute.xlu1 %1730  ;;  %v1709_v7 = vpop.permute.xlu0 %1708  ;;  %v4149_v6 = vsel %vm55_vm8, %v4683_v22, %v3995_v62  ;;  %v2025_v50 = vadd.f32 %v2017_v63, %v4684_v52  ;;  %v1682_v27 = vmul.f32 %v4680_v45, %v1576_v57  ;;  %v2030_v19 = vmax.f32 %v2022_v17, 0.0  ;;  %v4690_v49 = vld [vmem:[#allocation50_spill] sm:$0xff]  ;;  %v4693_v63 = vld [vmem:[#allocation51_spill] sm:$0xff] }
 0x462   :  { %v1691_v9 = vadd.f32 %v1683_v8, %v1659_v51  ;;  %v1658_v26 = vadd.f32 %v1650_v28, %v1626_v54  ;;  %v2024_v53 = vadd.f32 %v2016_v58, %v4684_v52  ;;  %v1947_v32 = vmul.f32 %v4687_v4, %v4149_v6  ;;  %v4689_v54 = vld [vmem:[#allocation46_spill] sm:$0xff]  ;;  %v4692_v8 = vld [vmem:[#allocation8_spill] sm:$0xff] }
 0x463   :  { %v2033_v30 = vmax.f32 %v2025_v50, 0.0  ;;  %v1818_v55 = vmul.f32 %v4685_v3, %v3864_v25  ;;  %v1979_v11 = vmul.f32 %v4689_v54, %v4688_v20  ;;  %v4691_v25 = vld [vmem:[#allocation40_spill] sm:$0xff]  ;;  %v1884_v28 = vsel %vm55_vm8, %v3995_v62, %v4683_v22 }
 0x464   :  { %v1795_v41 = vadd.f32 %v1787_v43, %v1691_v9  ;;  %v1690_v24 = vadd.f32 %v1682_v27, %v1658_v26  ;;  %v2032_v37 = vmax.f32 %v2024_v53, 0.0  ;;  %v1652_v51 = vmul.f32 %v4691_v25, %v4690_v49  ;;  %v4694_v53 = vld [vmem:[#allocation11_spill] sm:$0xff] }
 0x465   :  { %v1739_v34 = vpop.permute.xlu1 %1738  ;;  %v1717_v21 = vpop.permute.xlu0 %1716  ;;  %v2335_v38 = vpack.c.bf16 %v2033_v30, %v2031_v60  ;;  %v1653_v58 = vmul.f32 %v4691_v25, %v4693_v63  ;;  %v4696_v60 = vld [vmem:[#allocation48_spill] sm:$0xff]  ;;  %v4703_v25 = vld [vmem:[#allocation45_spill] sm:$0xff] }
 0x466   :  { %v1744_v36 = vsel %vm457_vm9, %v1731_v33, %v1739_v34  ;;  %v1748_v14 = vsel %vm457_vm9, %v1739_v34, %v1731_v33  ;;  %v1827_v46 = vadd.f32 %v1819_v16, %v1795_v41  ;;  %v2337_v56 = vpack.c.bf16 %v2032_v37, %v2030_v19  ;;  %v4697_v37 = vld [vmem:[#allocation30_spill] sm:$0xff] }
 0x467   :  { %v1754_v31 = vsel %vm55_vm8, %v1744_v36, %v1724_v44  ;;  %v1763_v10 = vsel %vm58_vm10, %v1720_v1, %v1748_v14  ;;  %2336 = vmatprep.subr.bf16.mxu0 %v2335_v38  ;;  %v1850_v45 = vmul.f32 %v4686_v18, %v1744_v36  ;;  %v1725_v43 = vsel %vm55_vm8, %v1717_v21, %v1709_v7  ;;  %v4695_v14 = vld [vmem:[#allocation24_spill] sm:$0xff] }
 0x468   :  { %v1786_v2 = vmul.f32 %v4681_v48, %v1754_v31  ;;  %v1851_v13 = vmul.f32 %v4686_v18, %v1763_v10  ;;  %2338 = vmatpush1.bf16.msra.mxu0 %v2337_v56  ;;  %v1721_v48 = vsel %vm55_vm8, %v1709_v7, %v1717_v21 }
 0x469   :  { %v1541_v39 = vpop.permute.xlu1 %1540  ;;  %v1733_v42 = vpop.permute.xlu0 %1732  ;;  %v1789_v31 = vmul.f32 %v4695_v14, %v1721_v48 }
 0x46a   :  { %v1794_v47 = vadd.f32 %v1786_v2, %v1690_v24  ;;  %v1859_v61 = vadd.f32 %v1851_v13, %v1827_v46 }
 0x46c   :  { %v1826_v0 = vadd.f32 %v1818_v55, %v1794_v47  ;;  %v1955_v57 = vadd.f32 %v1947_v32, %v1859_v61  ;;  %v4699_v61 = vld [vmem:[#allocation60_spill] sm:$0xff] }
 0x46d   :  { %v1549_v12 = vpop.permute.xlu1 %1548  ;;  %v1741_v35 = vpop.permute.xlu0 %1740 }
 0x46e   :  { %v1553_v1 = vsel %vm55_vm8, %v1541_v39, %v1549_v12  ;;  %v1858_v9 = vadd.f32 %v1850_v45, %v1826_v0  ;;  %v1557_v40 = vsel %vm55_vm8, %v1549_v12, %v1541_v39  ;;  %v1745_v23 = vsel %vm457_vm9, %v1733_v42, %v1741_v35  ;;  %v4700_v0 = vld [vmem:[#allocation31_spill] sm:$0xff]  ;;  %v4704_v45 = vld [vmem:[#allocation21_spill] sm:$0xff] }
 0x46f   :  { %v1629_v33 = vmul.f32 %v4692_v8, %v1553_v1  ;;  %v1749_v26 = vsel %vm457_vm9, %v1741_v35, %v1733_v42  ;;  %v1756_v10 = vsel %vm55_vm8, %v1745_v23, %v1725_v43  ;;  %v1987_v46 = vadd.f32 %v1979_v11, %v1955_v57  ;;  %v4701_v12 = vld [vmem:[#allocation23_spill] sm:$0xff] }
 0x470   :  { %v1765_v19 = vsel %vm58_vm10, %v1721_v48, %v1749_v26  ;;  %v1788_v42 = vmul.f32 %v4695_v14, %v1756_v10  ;;  %v4710_v14 = vld [vmem:[#allocation36_spill] sm:$0xff] }
 0x471   :  { %v1565_v15 = vpop.permute.xlu1 %1564  ;;  %v1891_v59 = vpop.permute.xlu0 %1890  ;;  %v1661_v16 = vadd.f32 %v1653_v58, %v1629_v33  ;;  %v1853_v35 = vmul.f32 %v4701_v12, %v1765_v19  ;;  %v4713_v19 = vld [vmem:[#allocation53_spill] sm:$0xff] }
 0x475   :  { %v1573_v62 = vpop.permute.xlu1 %1572  ;;  %v1899_v22 = vpop.permute.xlu0 %1898 }
 0x476   :  { %v1577_v52 = vsel %vm457_vm9, %v1565_v15, %v1573_v62  ;;  %v1581_v50 = vsel %vm457_vm9, %v1573_v62, %v1565_v15  ;;  %v1904_v7 = vsel %vm457_vm9, %v1891_v59, %v1899_v22  ;;  %v1908_v3 = vsel %vm457_vm9, %v1899_v22, %v1891_v59  ;;  %v4702_v59 = vld [vmem:[#allocation44_spill] sm:$0xff] }
 0x477   :  { %v1588_v41 = vsel %vm55_vm8, %v1577_v52, %v1557_v40  ;;  %v1597_v34 = vsel %vm58_vm10, %v1553_v1, %v1581_v50  ;;  %v1914_v21 = vsel %vm55_vm8, %v1904_v7, %v1884_v28  ;;  %v1923_v27 = vsel %vm58_vm10, %v4149_v6, %v1908_v3  ;;  %v4706_v50 = vld [vmem:[#allocation49_spill] sm:$0xff] }
 0x478   :  { %v1628_v17 = vmul.f32 %v4692_v8, %v1588_v41  ;;  %v1685_v44 = vmul.f32 %v4694_v53, %v1597_v34  ;;  %v1946_v36 = vmul.f32 %v4687_v4, %v1914_v21  ;;  %v2011_v24 = vmul.f32 %v4696_v60, %v1923_v27  ;;  %v4698_v4 = vld [vmem:[#allocation9_spill] sm:$0xff]  ;;  %v4705_v8 = vld [vmem:[#allocation47_spill] sm:$0xff] }
 0x479   :  { %v1877_v2 = vpop.permute.xlu1 %1876  ;;  %v1684_v13 = vmul.f32 %v4694_v53, %v1577_v52  ;;  %v1821_v39 = vmul.f32 %v4698_v4, %v4697_v37  ;;  %v1820_v57 = vmul.f32 %v4698_v4, %v4700_v0  ;;  %v1978_v20 = vmul.f32 %v4689_v54, %v4702_v59  ;;  %v4714_v4 = vld [vmem:[#allocation5_spill] sm:$0xff]  ;;  %v4717_v59 = vld [vmem:[#allocation59_spill] sm:$0xff] }
 0x47a   :  { %v1660_v18 = vadd.f32 %v1652_v51, %v1628_v17  ;;  %v1693_v30 = vadd.f32 %v1685_v44, %v1661_v16  ;;  %v1954_v32 = vadd.f32 %v1946_v36, %v1858_v9  ;;  %v2019_v6 = vadd.f32 %v2011_v24, %v1987_v46  ;;  %v4707_v16 = vld [vmem:[#allocation20_spill] sm:$0xff] }
 0x47b   :  { %v1881_v38 = vsel %vm55_vm8, %v4699_v61, %v1877_v2  ;;  %v1981_v33 = vmul.f32 %v4705_v8, %v4704_v45  ;;  %v1852_v28 = vmul.f32 %v4701_v12, %v1745_v23  ;;  %v1885_v48 = vsel %vm55_vm8, %v1877_v2, %v4699_v61  ;;  %v4709_v44 = vld [vmem:[#allocation16_spill] sm:$0xff] }
 0x47c   :  { %v1692_v55 = vadd.f32 %v1684_v13, %v1660_v18  ;;  %v1797_v47 = vadd.f32 %v1789_v31, %v1693_v30  ;;  %v1949_v51 = vmul.f32 %v4703_v25, %v1881_v38  ;;  %v1986_v58 = vadd.f32 %v1978_v20, %v1954_v32  ;;  %v4712_v30 = vld [vmem:[#allocation52_spill] sm:$0xff] }
 0x47d   :  { %v1893_v56 = vpop.permute.xlu1 %1892  ;;  %v2010_v54 = vmul.f32 %v4696_v60, %v1904_v7  ;;  %v1980_v41 = vmul.f32 %v4705_v8, %v4707_v16  ;;  %v2027_v31 = vadd.f32 %v2019_v6, %v4710_v14  ;;  %v4711_v60 = vld [vmem:[#allocation6_spill] sm:$0xff] }
 0x47e   :  { %v1796_v1 = vadd.f32 %v1788_v42, %v1692_v55  ;;  %v1829_v15 = vadd.f32 %v1821_v39, %v1797_v47  ;;  %v4715_v42 = vld [vmem:[#allocation39_spill] sm:$0xff] }
 0x47f   :  { %v2018_v34 = vadd.f32 %v2010_v54, %v1986_v58  ;;  %v2035_v47 = vmax.f32 %v2027_v31, 0.0  ;;  %v965_v31 = vld [vmem:[#allocation2 + $0xe8] sm:$0xff] }
 0x480   :  { %v1828_v11 = vadd.f32 %v1820_v57, %v1796_v1  ;;  %v1861_v49 = vadd.f32 %v1853_v35, %v1829_v15  ;;  %v4716_v1 = vld [vmem:[#allocation58_spill] sm:$0xff] }
 0x481   :  { %v1901_v63 = vpop.permute.xlu1 %1900  ;;  %v2026_v2 = vadd.f32 %v2018_v34, %v4710_v14  ;;  %v964_v14 = vld [vmem:[#allocation2 + $0xe0] sm:$0xff] }
 0x482   :  { %v1957_v43 = vadd.f32 %v1949_v51, %v1861_v49  ;;  %v1905_v9 = vsel %vm457_vm9, %v1893_v56, %v1901_v63  ;;  %v1909_v40 = vsel %vm457_vm9, %v1901_v63, %v1893_v56  ;;  %v1860_v23 = vadd.f32 %v1852_v28, %v1828_v11  ;;  %v4718_v11 = vld [vmem:[#allocation12_spill] sm:$0xff]  ;;  %v960_v28 = vld [vmem:[#allocation2 + $0xa0] sm:$0xff]  ;;  %v961_v63 = vld [vmem:[#allocation2 + $0xa8] sm:$0xff] }
 0x483   :  { %v1916_v26 = vsel %vm55_vm8, %v1905_v9, %v1885_v48  ;;  %v1925_v22 = vsel %vm58_vm10, %v1881_v38, %v1909_v40  ;;  %v2012_v36 = vmul.f32 %v4706_v50, %v1905_v9  ;;  %v2034_v0 = vmax.f32 %v2026_v2, 0.0  ;;  %v4720_v40 = vld [vmem:[#allocation10_spill] sm:$0xff] }
 0x484   :  { %v1989_v62 = vadd.f32 %v1981_v33, %v1957_v43  ;;  %v1948_v52 = vmul.f32 %v4703_v25, %v1916_v26  ;;  %v2013_v3 = vmul.f32 %v4706_v50, %v1925_v22  ;;  %v4719_v25 = vld [vmem:[#allocation41_spill] sm:$0xff]  ;;  %v4722_v22 = vld [vmem:[#allocation32_spill] sm:$0xff]  ;;  %v4723_v50 = vld [vmem:[#allocation43_spill] sm:$0xff] }
 0x485   :  { %v2038_v43 = vld [vmem:[%s4413_s3] sm:$0xff] }
 0x486   :  { %v1956_v7 = vadd.f32 %v1948_v52, %v1860_v23  ;;  %v4256_v21 = vpop.permute.xlu0 %968  ;;  %v2021_v17 = vadd.f32 %v2013_v3, %v1989_v62  ;;  %v4721_v62 = vld [vmem:[#allocation35_spill] sm:$0xff] }
 0x487   :  { %v1098_v53 = vadd.f32 %v4708_v5, %v4256_v21  ;;  %v1100_v27 = vadd.f32 %v4709_v44, %v4256_v21  ;;  %v4724_v5 = vmov 0.0   ;;  %v4725_v44 = vld [vmem:[#allocation54_spill] sm:$0xff] }
 0x488   :  { %v1988_v29 = vadd.f32 %v1980_v41, %v1956_v7  ;;  %v2029_v24 = vadd.f32 %v2021_v17, %v4711_v60 }
 0x489   :  { %v1144_v10 = vmax.f32 %v1098_v53, 0.0  ;;  %v1145_v46 = vmax.f32 %v1100_v27, 0.0  ;;  %v2039_v53 = vld [vmem:[%s4413_s3 + $0x8] sm:$0xff] }
 0x48a   :  { %v2020_v18 = vadd.f32 %v2012_v36, %v1988_v29  ;;  %v4266_v13 = vpop.permute.xlu0 %983  ;;  %v2037_v61 = vmax.f32 %v2029_v24, 0.0  ;;  %v4726_v29 = vld [vmem:[#allocation55_spill] sm:$0xff] }
 0x48b   :  { %v1160_v32 = vadd.f32 %v1144_v10, %v4712_v30  ;;  %v1161_v37 = vadd.f32 %v1145_v46, %v4713_v19  ;;  %v1116_v39 = vadd.f32 %v4714_v4, %v4266_v13  ;;  %v1118_v55 = vadd.f32 %v4715_v42, %v4266_v13  ;;  %v4727_v10 = vld [vmem:[#allocation14_spill] sm:$0xff]  ;;  %v4729_v4 = vld [vmem:[#allocation56_spill] sm:$0xff]  ;;  %v4730_v42 = vld [vmem:[#allocation57_spill] sm:$0xff] }
 0x48c   :  { %v2028_v6 = vadd.f32 %v2020_v18, %v4711_v60  ;;  %v2339_v35 = vpack.c.bf16 %v2037_v61, %v2035_v47  ;;  %v4728_v60 = vld [vmem:[#allocation37_spill] sm:$0xff]  ;;  %v4732_v61 = vld [vmem:[#allocation7_spill] sm:$0xff] }
 0x48d   :  { %1176 = vst [vmem:[#allocation2] sm:$0xff] %v1160_v32  ;;  %1177 = vst [vmem:[#allocation2 + $0x8] sm:$0xff] %v1161_v37  ;;  %v1150_v38 = vmax.f32 %v1116_v39, 0.0  ;;  %v1151_v56 = vmax.f32 %v1118_v55, 0.0  ;;  %v2040_v37 = vld [vmem:[%s4413_s3 + $0x10] sm:$0xff] }
 0x48e   :  { %v2036_v57 = vmax.f32 %v2028_v6, 0.0  ;;  %v4275_v12 = vpop.permute.xlu0 %993  ;;  %2340 = vmatprep.subr.bf16.mxu0 %v2339_v35  ;;  %v4731_v6 = vld [vmem:[#allocation15_spill] sm:$0xff]  ;;  %v959_v35 = vld [vmem:[#allocation2 + $0x88] sm:$0xff] }
 0x48f   :  { %v1166_v15 = vadd.f32 %v1150_v38, %v4716_v1  ;;  %v1167_v20 = vadd.f32 %v1151_v56, %v4717_v59  ;;  %v1128_v49 = vadd.f32 %v4718_v11, %v4275_v12  ;;  %v1130_v51 = vadd.f32 %v4719_v25, %v4275_v12  ;;  %v4733_v11 = vld [vmem:[#allocation18_spill] sm:$0xff] }
 0x490   :  { %v2341_v45 = vpack.c.bf16 %v2036_v57, %v2034_v0  ;;  %v958_v57 = vld [vmem:[#allocation2 + $0x80] sm:$0xff]  ;;  %v4734_v25 = vld [vmem:[#allocation38_spill] sm:$0xff] }
 0x491   :  { %1182 = vst [vmem:[#allocation2 + $0x60] sm:$0xff] %v1166_v15  ;;  %1183 = vst [vmem:[#allocation2 + $0x68] sm:$0xff] %v1167_v20  ;;  %v1154_v8 = vmax.f32 %v1128_v49, 0.0  ;;  %v1155_v33 = vmax.f32 %v1130_v51, 0.0  ;;  %v2041_v15 = vld [vmem:[%s4413_s3 + $0x18] sm:$0xff] }
 0x492   :  { %v4283_v58 = vpop.permute.xlu1 %973  ;;  %v4285_v48 = vpop.permute.xlu0 %1003  ;;  %2342 = vmatpush1.bf16.msra.mxu0 %v2341_v45 }
 0x493   :  { %v1170_v9 = vadd.f32 %v1154_v8, %v960_v28  ;;  %v1171_v54 = vadd.f32 %v1155_v33, %v961_v63  ;;  %v1104_v26 = vadd.f32 %v4720_v40, %v4283_v58  ;;  %v1106_v23 = vadd.f32 %v4721_v62, %v4283_v58  ;;  %v962_v33 = vld [vmem:[#allocation2 + $0xc0] sm:$0xff]  ;;  %v963_v28 = vld [vmem:[#allocation2 + $0xc8] sm:$0xff]  ;;  %v2044_v40 = vld [vmem:[%s4413_s3 + $0x30] sm:$0xff] }
 0x494   :  { %v1140_v52 = vadd.f32 %v4722_v22, %v4285_v48  ;;  %v1142_v3 = vadd.f32 %v4723_v50, %v4285_v48  ;;  %v2042_v63 = vld [vmem:[%s4413_s3 + $0x20] sm:$0xff] }
 0x495   :  { %1186 = vst [vmem:[#allocation2 + $0xa0] sm:$0xff] %v1170_v9  ;;  %1187 = vst [vmem:[#allocation2 + $0xa8] sm:$0xff] %v1171_v54  ;;  %v1146_v16 = vmax.f32 %v1104_v26, 0.0  ;;  %v1147_v41 = vmax.f32 %v1106_v23, 0.0  ;;  %2303 = vmatmul.mubr.msk.f32.vlgmr.msra.gmra.mrb[24].mxu0 %vm1006_vm11, %v2038_v43  ;;  %v2043_v54 = vld [vmem:[%s4413_s3 + $0x28] sm:$0xff]  ;;  %v2045_v26 = vld [vmem:[%s4413_s3 + $0x38] sm:$0xff] }
 0x496   :  { %v1158_v34 = vmax.f32 %v1140_v52, 0.0  ;;  %v1159_v7 = vmax.f32 %v1142_v3, 0.0  ;;  %v4299_v17 = vpop.permute.xlu1 %978  ;;  %2156 = vmatprep.mubr.f32.mxu0 %v4724_v5  ;;  %s2461_s3 = smov [#allocation2]  }
 0x497   :  { %v1162_v27 = vadd.f32 %v1146_v16, %v4725_v44  ;;  %v1163_v36 = vadd.f32 %v1147_v41, %v4726_v29  ;;  %v1110_v46 = vadd.f32 %v4727_v10, %v4299_v17  ;;  %v1112_v24 = vadd.f32 %v4728_v60, %v4299_v17  ;;  %s2252_s27 = sshll.u32 %s2461_s3, 4  ;;  %s2253_s27 = int_to_ptr.vmem [resolvable:$true] %s2252_s27 }
 0x498   :  { %v1174_v2 = vadd.f32 %v1158_v34, %v964_v14  ;;  %v1175_v18 = vadd.f32 %v1159_v7, %v965_v31  ;;  %s2422_s28 = scalar_lea.vmem %s2253_s27, 4096  ;;  %p2427_p1 = scmp.lt.s32.totalorder %s2253_s27, %s2253_s27 }
 0x499   :  { %1178 = vst [vmem:[#allocation2 + $0x20] sm:$0xff] %v1162_v27  ;;  %1179 = vst [vmem:[#allocation2 + $0x28] sm:$0xff] %v1163_v36  ;;  %v1148_v30 = vmax.f32 %v1110_v46, 0.0  ;;  %v1149_v32 = vmax.f32 %v1112_v24, 0.0  ;;  %2304 = vmatmul.mubr.msk.f32.gmra.mrb[26].mxu0 %vm1006_vm11, %v2039_v53  ;;  %v4735_v36 = vld [vmem:[#allocation61_spill] sm:$0xff]  ;;  %v4736_v46 = vld [vmem:[#allocation62_spill] sm:$0xff]  ;;  %p2423_p0 = scmp.ne.s32.totalorder %s2253_s27, %s2422_s28  ;;  %p2428_p2 = scmp.lt.s32.totalorder %s2422_s28, %s2422_s28 }
 0x49a   :  { %1190 = vst [vmem:[#allocation2 + $0xe0] sm:$0xff] %v1174_v2  ;;  %1191 = vst [vmem:[#allocation2 + $0xe8] sm:$0xff] %v1175_v18  ;;  %v4312_v19 = vpop.permute.xlu1 %988  ;;  %2162 = vmatprep.mubr.f32.mxu0 %v4724_v5 }
 0x49b   :  { %v1164_v39 = vadd.f32 %v1148_v30, %v4729_v4  ;;  %v1165_v55 = vadd.f32 %v1149_v32, %v4730_v42  ;;  %v1122_v47 = vadd.f32 %v4731_v6, %v4312_v19  ;;  %v1124_v38 = vadd.f32 %v4732_v61, %v4312_v19  ;;  %v4737_v32 = vld [vmem:[#allocation63_spill] sm:$0xff]  ;;  %p2429_p3 = por %p2428_p2, %p2427_p1 }
 0x49d   :  { %1180 = vst [vmem:[#allocation2 + $0x40] sm:$0xff] %v1164_v39  ;;  %1181 = vst [vmem:[#allocation2 + $0x48] sm:$0xff] %v1165_v55  ;;  %v1152_v56 = vmax.f32 %v1122_v47, 0.0  ;;  %v1153_v0 = vmax.f32 %v1124_v38, 0.0  ;;  %2305 = vmatmul.mubr.msk.f32.gmra.mrb[28].mxu0 %vm1006_vm11, %v2040_v37  ;;  %v4738_v39 = vld [vmem:[#allocation64_spill] sm:$0xff]  ;;  %p2430_p4 = pnand %p2429_p3, %p2423_p0 }
 0x49e   :  { %v4325_v1 = vpop.permute.xlu1 %998  ;;  %2168 = vmatprep.mubr.f32.mxu0 %v4724_v5 }
 0x49f   :  { %v1168_v59 = vadd.f32 %v1152_v56, %v958_v57  ;;  %v1169_v20 = vadd.f32 %v1153_v0, %v959_v35  ;;  %v1134_v49 = vadd.f32 %v4733_v11, %v4325_v1  ;;  %v1136_v51 = vadd.f32 %v4734_v25, %v4325_v1  ;;  %v4740_v57 = vld [vmem:[#allocation66_spill] sm:$0xff] }
 0x4a1   :  { %1184 = vst [vmem:[#allocation2 + $0x80] sm:$0xff] %v1168_v59  ;;  %1185 = vst [vmem:[#allocation2 + $0x88] sm:$0xff] %v1169_v20  ;;  %v1156_v45 = vmax.f32 %v1134_v49, 0.0  ;;  %v1157_v8 = vmax.f32 %v1136_v51, 0.0  ;;  %2306 = vmatmul.mubr.msk.f32.gmra.mrb[30].mxu0 %vm1006_vm11, %v2041_v15 }
 0x4a2   :  { %2174 = vmatprep.mubr.f32.mxu0 %v4724_v5 }
 0x4a3   :  { %v1172_v43 = vadd.f32 %v1156_v45, %v962_v33  ;;  %v1173_v9 = vadd.f32 %v1157_v8, %v963_v28  ;;  %v4742_v45 = vld [vmem:[#allocation68_spill] sm:$0xff] }
 0x4a5   :  { %1188 = vst [vmem:[#allocation2 + $0xc0] sm:$0xff] %v1172_v43  ;;  %1189 = vst [vmem:[#allocation2 + $0xc8] sm:$0xff] %v1173_v9  ;;  %2307 = vmatmul.mubr.msk.f32.gmra.mrb[32].mxu0 %vm1006_vm11, %v2042_v63 }
 0x4a6   :  { %2180 = vmatprep.mubr.f32.mxu0 %v4724_v5 }
 0x4a9   :  { %2308 = vmatmul.mubr.msk.f32.gmra.mrb[34].mxu0 %vm1006_vm11, %v2043_v54 }
 0x4aa   :  { %2186 = vmatprep.mubr.f32.mxu0 %v4724_v5 }
 0x4ad   :  { %2309 = vmatmul.mubr.msk.f32.gmra.mrb[36].mxu0 %vm1006_vm11, %v2044_v40 }
 0x4ae   :  { %2192 = vmatprep.mubr.f32.mxu0 %v4724_v5 }
 0x4b1   :  { %2310 = vmatmul.mubr.msk.f32.gmra.mrb[38].mxu0 %vm1006_vm11, %v2045_v26 }
 0x4b7   :  { %v1326_v62 = vpop.f32.mrb[16].mxu0 }
 0x4b8   :  { %v1328_v23 = vpop.f32.mrb[17].mxu0 }
 0x4bb   :  { %v4356_v22 = vpop.f32.mrb[18].mxu0 }
 0x4bc   :  { %v4358_v52 = vpop.f32.mrb[19].mxu0 }
 0x4e3   :  { %v4360_v50 = vpop.f32.mrb[20].mxu0 }
 0x4e4   :  { %v4362_v3 = vpop.f32.mrb[21].mxu0 }
 0x4e7   :  { %v4364_v16 = vpop.f32.mrb[22].mxu0 }
 0x4e8   :  { %v4366_v41 = vpop.f32.mrb[23].mxu0 }
 0x568   :  { %v2152_v34 = vpop.f32.mrb[24].mxu0 }
 0x569   :  { %v2153_v7 = vadd.f32 %v2152_v34, %v4256_v21  ;;  %v2154_v5 = vpop.f32.mrb[25].mxu0 }
 0x56a   :  { %v2155_v53 = vadd.f32 %v2154_v5, %v4256_v21 }
 0x56b   :  { %v2199_v44 = vmax.f32 %v2153_v7, 0.0 }
 0x56c   :  { %v2200_v27 = vmax.f32 %v2155_v53, 0.0  ;;  %v2158_v29 = vpop.f32.mrb[26].mxu0 }
 0x56d   :  { %v2215_v14 = vadd.f32 %v2199_v44, %v4735_v36  ;;  %v2159_v31 = vadd.f32 %v2158_v29, %v4283_v58  ;;  %v2160_v10 = vpop.f32.mrb[27].mxu0 }
 0x56e   :  { %v2216_v60 = vadd.f32 %v2200_v27, %v4736_v46  ;;  %v2161_v24 = vadd.f32 %v2160_v10, %v4283_v58  ;;  %v4739_v58 = vld [vmem:[#allocation65_spill] sm:$0xff] }
 0x56f   :  { %2231 = vst [vmem:[#allocation2 + $0x10] sm:$0xff] %v2215_v14  ;;  %v2201_v2 = vmax.f32 %v2159_v31, 0.0 }
 0x570   :  { %2232 = vst [vmem:[#allocation2 + $0x18] sm:$0xff] %v2216_v60  ;;  %v2202_v18 = vmax.f32 %v2161_v24, 0.0  ;;  %v2164_v30 = vpop.f32.mrb[28].mxu0 }
 0x571   :  { %v2217_v37 = vadd.f32 %v2201_v2, %v4737_v32  ;;  %v2165_v21 = vadd.f32 %v2164_v30, %v4299_v17  ;;  %v2166_v4 = vpop.f32.mrb[29].mxu0 }
 0x572   :  { %v2218_v42 = vadd.f32 %v2202_v18, %v4738_v39  ;;  %v2167_v55 = vadd.f32 %v2166_v4, %v4299_v17  ;;  %v4741_v17 = vld [vmem:[#allocation67_spill] sm:$0xff] }
 0x573   :  { %2233 = vst [vmem:[#allocation2 + $0x30] sm:$0xff] %v2217_v37  ;;  %v2203_v6 = vmax.f32 %v2165_v21, 0.0 }
 0x574   :  { %2234 = vst [vmem:[#allocation2 + $0x38] sm:$0xff] %v2218_v42  ;;  %v2204_v47 = vmax.f32 %v2167_v55, 0.0  ;;  %v2170_v61 = vpop.f32.mrb[30].mxu0 }
 0x575   :  { %v2219_v38 = vadd.f32 %v2203_v6, %v4739_v58  ;;  %v2171_v56 = vadd.f32 %v2170_v61, %v4266_v13  ;;  %v2172_v0 = vpop.f32.mrb[31].mxu0 }
 0x576   :  { %v2220_v35 = vadd.f32 %v2204_v47, %v4740_v57  ;;  %v2173_v15 = vadd.f32 %v2172_v0, %v4266_v13 }
 0x577   :  { %2235 = vst [vmem:[#allocation2 + $0x50] sm:$0xff] %v2219_v38  ;;  %v2205_v59 = vmax.f32 %v2171_v56, 0.0 }
 0x578   :  { %2236 = vst [vmem:[#allocation2 + $0x58] sm:$0xff] %v2220_v35  ;;  %v2206_v20 = vmax.f32 %v2173_v15, 0.0  ;;  %v2176_v11 = vpop.f32.mrb[32].mxu0 }
 0x579   :  { %v2221_v49 = vadd.f32 %v2205_v59, %v4741_v17  ;;  %v2177_v25 = vadd.f32 %v2176_v11, %v4312_v19  ;;  %v2178_v51 = vpop.f32.mrb[33].mxu0 }
 0x57a   :  { %v2222_v8 = vadd.f32 %v2206_v20, %v4742_v45  ;;  %v2179_v33 = vadd.f32 %v2178_v51, %v4312_v19 }
 0x57b   :  { %2237 = vst [vmem:[#allocation2 + $0x70] sm:$0xff] %v2221_v49  ;;  %v2207_v28 = vmax.f32 %v2177_v25, 0.0 }
 0x57c   :  { %2238 = vst [vmem:[#allocation2 + $0x78] sm:$0xff] %v2222_v8  ;;  %v2208_v63 = vmax.f32 %v2179_v33, 0.0  ;;  %v2182_v43 = vpop.f32.mrb[34].mxu0 }
 0x57d   :  { %v2223_v13 = vadd.f32 %v2207_v28, %v1326_v62  ;;  %v2183_v9 = vadd.f32 %v2182_v43, %v4275_v12  ;;  %v2184_v54 = vpop.f32.mrb[35].mxu0 }
 0x57e   :  { %v2224_v40 = vadd.f32 %v2208_v63, %v1328_v23  ;;  %v2185_v26 = vadd.f32 %v2184_v54, %v4275_v12 }
 0x57f   :  { %2239 = vst [vmem:[#allocation2 + $0x90] sm:$0xff] %v2223_v13  ;;  %v2209_v34 = vmax.f32 %v2183_v9, 0.0 }
 0x580   :  { %2240 = vst [vmem:[#allocation2 + $0x98] sm:$0xff] %v2224_v40  ;;  %v2210_v7 = vmax.f32 %v2185_v26, 0.0  ;;  %v2188_v5 = vpop.f32.mrb[36].mxu0 }
 0x581   :  { %v2225_v53 = vadd.f32 %v2209_v34, %v4356_v22  ;;  %v2189_v19 = vadd.f32 %v2188_v5, %v4325_v1  ;;  %v2190_v44 = vpop.f32.mrb[37].mxu0 }
 0x582   :  { %v2226_v27 = vadd.f32 %v2210_v7, %v4358_v52  ;;  %v2191_v62 = vadd.f32 %v2190_v44, %v4325_v1 }
 0x583   :  { %2241 = vst [vmem:[#allocation2 + $0xb0] sm:$0xff] %v2225_v53  ;;  %v2211_v29 = vmax.f32 %v2189_v19, 0.0 }
 0x584   :  { %2242 = vst [vmem:[#allocation2 + $0xb8] sm:$0xff] %v2226_v27  ;;  %v2212_v23 = vmax.f32 %v2191_v62, 0.0  ;;  %v2194_v36 = vpop.f32.mrb[38].mxu0 }
 0x585   :  { %v2227_v12 = vadd.f32 %v2211_v29, %v4360_v50  ;;  %v2195_v14 = vadd.f32 %v2194_v36, %v4285_v48  ;;  %v2196_v31 = vpop.f32.mrb[39].mxu0 }
 0x586   :  { %v2228_v10 = vadd.f32 %v2212_v23, %v4362_v3  ;;  %v2197_v22 = vadd.f32 %v2196_v31, %v4285_v48 }
 0x587   :  { %2243 = vst [vmem:[#allocation2 + $0xd0] sm:$0xff] %v2227_v12  ;;  %v2213_v46 = vmax.f32 %v2195_v14, 0.0 }
 0x588   :  { %2244 = vst [vmem:[#allocation2 + $0xd8] sm:$0xff] %v2228_v10  ;;  %v2214_v1 = vmax.f32 %v2197_v22, 0.0 }
 0x589   :  { %v2229_v52 = vadd.f32 %v2213_v46, %v4364_v16 }
 0x58a   :  { %v2230_v60 = vadd.f32 %v2214_v1, %v4366_v41 }
 0x58b   :  { %2245 = vst [vmem:[#allocation2 + $0xf0] sm:$0xff] %v2229_v52 }
 0x58c   :  { %2246 = vst [vmem:[#allocation2 + $0xf8] sm:$0xff] %v2230_v60 }
 0x58d   :  { %2433 = shalt.err (!%p2430_p4)
}
 0x58e   :  { %s2434_s7 = scalar_lea.hbm %s4416_s6, 4096 }
 0x58f   :  { %p2435_p5 = scmp.ne.s32.totalorder %s4416_s6, %s2434_s7  ;;  %p2438_p6 = scmp.lt.u32.totalorder %s2434_s7, %s4416_s6 }
 0x591   :  { %p2440_p7 = pnand %p2438_p6, %p2435_p5 }
 0x593   :  { %2443 = shalt.err (!%p2440_p7)
}
 0x594   :  { %s2462_s15 = smov 512   ;;  %s2463_s16 = smov 32  }
 0x595   :  { %2258 = dma.vmem_to_hbm [thread:$0]  %s2253_s27, 4096, %s4416_s6, [#allocation3], %s2462_s15, %s2462_s15, %s2463_s16  }
 0x596   :  { %2444 = dma.done.wait [#allocation3], 4096  }
 0x597   :  { %2445 = vsyncadd [#allocation3], 4294963200 }
 0x598   :  { %2262 = vsyncpa [#allocation3], 1 }

</bundles_post_ra>
